<compile_context>
chip_gen: v5e
topology: v5e:2x2
jax: 0.10.0
libtpu: 0.0.40
codegen_flags: <defaults>
</compile_context>

<pallas_src>
import jax
import jax.numpy as jnp
from jax.experimental import pallas as pl
from jax.experimental.pallas import tpu as pltpu

# ---- small, TPU-friendly shapes consistent with the module's forward ----
B = 2            # batch
S = 8            # decoder seq_len        (module default 40)
SE = 8           # encoder seq_len (enc_out)
D = 32           # d_model                (module default 512)
DFF = 64         # d_ff
H = 4            # n_heads
DK = D // H      # d_k per head
NUM_LAYERS = 2
EPS = 1e-5

assert D % H == 0

# Packed, layer-stacked parameter slabs (leading axis = NUM_LAYERS).
PACKED_KEYS = [
    "wqkv1", "bqkv1", "wo1", "bo1",                 # masked self-attn (fused QKV)
    "wq2", "bq2", "wkv2", "bkv2", "wo2", "bo2",     # cross-attn (fused KV)
    "ln_g", "ln_b",                                 # 3 LayerNorm((S,D)) packed
    "w1f", "b1f", "w2f", "b2f",                     # FFN
]


# ------------------------------ fused kernel ------------------------------
def fused_decoder_kernel(
        x_ref, enc_ref, mask_ref, enc_mask_ref,
        wqkv1_ref, bqkv1_ref, wo1_ref, bo1_ref,
        wq2_ref, bq2_ref, wkv2_ref, bkv2_ref, wo2_ref, bo2_ref,
        ln_g_ref, ln_b_ref, w1f_ref, b1f_ref, w2f_ref, b2f_ref,
        out_ref, att_scr):
    # Layer 0: pull x into the VMEM-resident carry (output block, constant index).
    @pl.when(pl.program_id(0) == 0)
    def _():
        out_ref[...] = x_ref[...]

    x = out_ref[...]                  # (B, S, D) carried activation
    enc = enc_ref[...]                # (B, SE, D)
    mask = mask_ref[...]              # (S, S)
    enc_mask = enc_mask_ref[...]      # (S, SE)
    scale = jnp.float32(1.0) / jnp.sqrt(jnp.float32(DK))

    def layernorm(y, idx):
        # nn.LayerNorm((seq_len, d_model)): stats over the whole (S, D) slab,
        # per batch element.  Chained single-axis reductions (lane then sublane).
        g = ln_g_ref[0, idx]          # (S, D)
        b = ln_b_ref[0, idx]
        inv_n = jnp.float32(1.0 / (S * D))
        mu = jnp.sum(jnp.sum(y, axis=2, keepdims=True),
                     axis=1, keepdims=True) * inv_n
        d = y - mu
        var = jnp.sum(jnp.sum(d * d, axis=2, keepdims=True),
                      axis=1, keepdims=True) * inv_n
        return d * jax.lax.rsqrt(var + EPS) * g + b

    def softmax_last(s):
        m = jnp.max(s, axis=-1, keepdims=True)
        e = jnp.exp(s - m)
        denom = jnp.sum(e, axis=-1, keepdims=True)
        # approx reciprocal -> EUP slot, off the VPU critical path
        return e * pl.reciprocal(denom, approx=True)

    def attention(q3, k3, v3, m):
        # q3: (B, Sq, D), k3/v3: (B, Sk, D), m: (Sq, Sk).  Heads stay packed in
        # the D axis; each head's output is slice-written into the VMEM scratch
        # (no jnp.concatenate).  Scale already folded into q.
        for h in range(H):            # static, unrolled head loop
            lo, hi = h * DK, (h + 1) * DK
            sc = jnp.einsum("bqd,bkd->bqk", q3[:, :, lo:hi], k3[:, :, lo:hi],
                            preferred_element_type=jnp.float32) + m
            p = softmax_last(sc)
            att_scr[:, :, pl.ds(lo, DK)] = jnp.einsum(
                "bqk,bkd->bqd", p, v3[:, :, lo:hi],
                preferred_element_type=jnp.float32)
        return att_scr[...].reshape(B * S, D)

    # ---------------- masked self-attention + norm1 ----------------
    x2 = x.reshape(B * S, D)
    qkv = jnp.dot(x2, wqkv1_ref[0].astype(jnp.float32),
                  preferred_element_type=jnp.float32) + bqkv1_ref[0]
    q3 = (qkv[:, 0 * D:1 * D] * scale).reshape(B, S, D)   # 1/sqrt(dk) applied once
    k3 = qkv[:, 1 * D:2 * D].reshape(B, S, D)
    v3 = qkv[:, 2 * D:3 * D].reshape(B, S, D)
    att = attention(q3, k3, v3, mask)
    sa = jnp.dot(att, wo1_ref[0].astype(jnp.float32),
                 preferred_element_type=jnp.float32) + bo1_ref[0]
    x = layernorm(x + sa.reshape(B, S, D), 0)

    # ---------------- cross-attention + norm2 ----------------
    x2 = x.reshape(B * S, D)
    q = (jnp.dot(x2, wq2_ref[0].astype(jnp.float32),
                 preferred_element_type=jnp.float32) + bq2_ref[0]) * scale
    enc2 = enc.reshape(B * SE, D)
    kv = jnp.dot(enc2, wkv2_ref[0].astype(jnp.float32),
                 preferred_element_type=jnp.float32) + bkv2_ref[0]
    q3 = q.reshape(B, S, D)
    k3 = kv[:, 0:D].reshape(B, SE, D)
    v3 = kv[:, D:2 * D].reshape(B, SE, D)
    att = attention(q3, k3, v3, enc_mask)
    ca = jnp.dot(att, wo2_ref[0].astype(jnp.float32),
                 preferred_element_type=jnp.float32) + bo2_ref[0]
    x = layernorm(x + ca.reshape(B, S, D), 1)

    # ---------------- FFN + norm3 ----------------
    x2 = x.reshape(B * S, D)
    hid = jnp.maximum(
        jnp.dot(x2, w1f_ref[0].astype(jnp.float32),
                preferred_element_type=jnp.float32) + b1f_ref[0], 0.0)
    ffn = jnp.dot(hid, w2f_ref[0].astype(jnp.float32),
                  preferred_element_type=jnp.float32) + b2f_ref[0]
    x = layernorm(x + ffn.reshape(B, S, D), 2)

    out_ref[...] = x


# ------------------------------ wrapper ------------------------------
def deep_decoder_pallas(x, enc_out, mask, enc_mask, packed):
    flat = tuple(packed[k] for k in PACKED_KEYS)

    def resident_spec(a):
        # Constant index_map: DMA'd once, stays VMEM-resident across all layers.
        nd = a.ndim
        return pl.BlockSpec(a.shape, lambda l, _nd=nd: (0,) * _nd)

    def layer_spec(a):
        # One layer's slab per grid step (pipelined by Pallas).
        nd = a.ndim
        return pl.BlockSpec((1,) + a.shape[1:],
                            lambda l, _nd=nd: (l,) + (0,) * (_nd - 1))

    in_specs = [resident_spec(x), resident_spec(enc_out),
                resident_spec(mask), resident_spec(enc_mask)]
    in_specs += [layer_spec(p) for p in flat]

    # Same output block every layer -> VMEM-resident activation carry,
    # written back to HBM only after the last layer.
    out_spec = pl.BlockSpec((B, S, D), lambda l: (0, 0, 0))

    return pl.pallas_call(
        fused_decoder_kernel,
        out_shape=jax.ShapeDtypeStruct((B, S, D), jnp.float32),
        grid_spec=pltpu.PrefetchScalarGridSpec(
            num_scalar_prefetch=0,
            grid=(NUM_LAYERS,),
            in_specs=in_specs,
            out_specs=out_spec,
            scratch_shapes=[pltpu.VMEM((B, S, D), jnp.float32)],  # head-concat slab
        ),
        compiler_params=pltpu.CompilerParams(
            dimension_semantics=("arbitrary",)),   # layers are sequential
    )(x, enc_out, mask, enc_mask, *flat)


# ------------------------------ param packing ------------------------------
def pack_layer_params(layer_params):
    """Stack per-layer dicts into layer-major slabs; big weights stored bf16."""
    bf16 = jnp.bfloat16

    def stack(fn, dtype=None):
        a = jnp.stack([fn(p) for p in layer_params], axis=0)
        return a.astype(dtype) if dtype is not None else a

    return {
        "wqkv1": stack(lambda p: jnp.concatenate([p["wq1"], p["wk1"], p["wv1"]], -1), bf16),
        "bqkv1": stack(lambda p: jnp.concatenate([p["bq1"], p["bk1"], p["bv1"]], -1)),
        "wo1":   stack(lambda p: p["wo1"], bf16),
        "bo1":   stack(lambda p: p["bo1"]),
        "wq2":   stack(lambda p: p["wq2"], bf16),
        "bq2":   stack(lambda p: p["bq2"]),
        "wkv2":  stack(lambda p: jnp.concatenate([p["wk2"], p["wv2"]], -1), bf16),
        "bkv2":  stack(lambda p: jnp.concatenate([p["bk2"], p["bv2"]], -1)),
        "wo2":   stack(lambda p: p["wo2"], bf16),
        "bo2":   stack(lambda p: p["bo2"]),
        "ln_g":  stack(lambda p: jnp.stack([p["g1"], p["g2"], p["g3"]], 0)),
        "ln_b":  stack(lambda p: jnp.stack([p["be1"], p["be2"], p["be3"]], 0)),
        "w1f":   stack(lambda p: p["w1f"], bf16),
        "b1f":   stack(lambda p: p["b1f"]),
        "w2f":   stack(lambda p: p["w2f"], bf16),
        "b2f":   stack(lambda p: p["b2f"]),
    }


# ------------------------- pure-JAX reference (check) -------------------------
def _ref_layer(x, enc, mask, enc_mask, p):
    def ln(y, g, b):
        mu = jnp.mean(y, axis=(1, 2), keepdims=True)
        var = jnp.mean((y - mu) ** 2, axis=(1, 2), keepdims=True)
        return (y - mu) / jnp.sqrt(var + EPS) * g + b

    def mha(q_in, kv_in, wq, bq, wk, bk, wv, bv, wo, bo, m):
        q = q_in @ wq + bq
        k = kv_in @ wk + bk
        v = kv_in @ wv + bv
        qh = q.reshape(B, q.shape[1], H, DK).transpose(0, 2, 1, 3)
        kh = k.reshape(B, k.shape[1], H, DK).transpose(0, 2, 1, 3)
        vh = v.reshape(B, v.shape[1], H, DK).transpose(0, 2, 1, 3)
        sc = jnp.einsum("bhqd,bhkd->bhqk", qh, kh) / jnp.sqrt(jnp.float32(DK)) + m
        sc = jax.nn.softmax(sc, axis=-1)
        o = jnp.einsum("bhqk,bhkd->bhqd", sc, vh)
        o = o.transpose(0, 2, 1, 3).reshape(B, q.shape[1], D)
        return o @ wo + bo

    x = x + mha(x, x, p["wq1"], p["bq1"], p["wk1"], p["bk1"],
                p["wv1"], p["bv1"], p["wo1"], p["bo1"], mask)
    x = ln(x, p["g1"], p["be1"])
    x = x + mha(x, enc, p["wq2"], p["bq2"], p["wk2"], p["bk2"],
                p["wv2"], p["bv2"], p["wo2"], p["bo2"], enc_mask)
    x = ln(x, p["g2"], p["be2"])
    hid = jax.nn.relu(x @ p["w1f"] + p["b1f"])
    x = ln(x + hid @ p["w2f"] + p["b2f"], p["g3"], p["be3"])
    return x


def deep_decoder_ref(x, enc, mask, enc_mask, layer_params):
    for p in layer_params:
        x = _ref_layer(x, enc, mask, enc_mask, p)
    return x


# ------------------------------ param init ------------------------------
def init_layer_params(key):
    ks = iter(jax.random.split(key, 32))

    def rnd(shape, scale=0.05):
        w = jax.random.normal(next(ks), shape, jnp.float32) * scale
        # Make values bf16-representable so bf16 weight storage in the kernel
        # is lossless vs. the f32 reference.
        return w.astype(jnp.bfloat16).astype(jnp.float32)

    p = {}
    for pre in ("1", "2"):  # self-attn, cross-attn
        p["wq" + pre] = rnd((D, D)); p["bq" + pre] = rnd((1, D))
        p["wk" + pre] = rnd((D, D)); p["bk" + pre] = rnd((1, D))
        p["wv" + pre] = rnd((D, D)); p["bv" + pre] = rnd((1, D))
        p["wo" + pre] = rnd((D, D)); p["bo" + pre] = rnd((1, D))
    for i in ("1", "2", "3"):  # LayerNorm((S, D)) default init
        p["g" + i] = jnp.ones((S, D), jnp.float32)
        p["be" + i] = jnp.zeros((S, D), jnp.float32)
    p["w1f"] = rnd((D, DFF)); p["b1f"] = rnd((1, DFF))
    p["w2f"] = rnd((DFF, D)); p["b2f"] = rnd((1, D))
    return p


if __name__ == "__main__":
    root = jax.random.PRNGKey(0)
    kx, kenc, kp = jax.random.split(root, 3)

    x = jax.random.normal(kx, (B, S, D), jnp.float32)
    enc_out = jax.random.normal(kenc, (B, SE, D), jnp.float32)

    # causal mask for the masked self-attention, no mask for cross-attention
    causal = jnp.tril(jnp.ones((S, S), jnp.float32))
    mask = jnp.where(causal > 0, 0.0, -1e9).astype(jnp.float32)
    enc_mask = jnp.zeros((S, SE), jnp.float32)

    layer_params = [init_layer_params(k)
                    for k in jax.random.split(kp, NUM_LAYERS)]
    packed = pack_layer_params(layer_params)

    out = deep_decoder_pallas(x, enc_out, mask, enc_mask, packed)
    out = jax.block_until_ready(out)

    ref = jax.block_until_ready(
        deep_decoder_ref(x, enc_out, mask, enc_mask, layer_params))

    max_diff = float(jnp.max(jnp.abs(out - ref)))
    assert out.shape == (B, S, D)
    # f32 compute everywhere; residual tolerance is dominated by the approximate
    # EUP reciprocal in softmax (otherwise ~1e-5 level).
    assert max_diff < 2e-2, f"mismatch vs reference: {max_diff}"
    print("KERNEL_OK")
</pallas_src>

<mosaic_0001>
module attributes {stable_mosaic.version = 11 : i64} {
  func.func @fused_decoder_kernel(%arg0: i32, %arg1: memref<2x8x32xf32, #tpu.memory_space<vmem>>, %arg2: memref<2x8x32xf32, #tpu.memory_space<vmem>>, %arg3: memref<8x8xf32, #tpu.memory_space<vmem>>, %arg4: memref<8x8xf32, #tpu.memory_space<vmem>>, %arg5: memref<1x32x96xbf16, #tpu.memory_space<vmem>>, %arg6: memref<1x1x96xf32, #tpu.memory_space<vmem>>, %arg7: memref<1x32x32xbf16, #tpu.memory_space<vmem>>, %arg8: memref<1x1x32xf32, #tpu.memory_space<vmem>>, %arg9: memref<1x32x32xbf16, #tpu.memory_space<vmem>>, %arg10: memref<1x1x32xf32, #tpu.memory_space<vmem>>, %arg11: memref<1x32x64xbf16, #tpu.memory_space<vmem>>, %arg12: memref<1x1x64xf32, #tpu.memory_space<vmem>>, %arg13: memref<1x32x32xbf16, #tpu.memory_space<vmem>>, %arg14: memref<1x1x32xf32, #tpu.memory_space<vmem>>, %arg15: memref<1x3x8x32xf32, #tpu.memory_space<vmem>>, %arg16: memref<1x3x8x32xf32, #tpu.memory_space<vmem>>, %arg17: memref<1x32x64xbf16, #tpu.memory_space<vmem>>, %arg18: memref<1x1x64xf32, #tpu.memory_space<vmem>>, %arg19: memref<1x64x32xbf16, #tpu.memory_space<vmem>>, %arg20: memref<1x1x32xf32, #tpu.memory_space<vmem>>, %arg21: memref<2x8x32xf32, #tpu.memory_space<vmem>>, %arg22: memref<2x8x32xf32, #tpu.memory_space<vmem>>) attributes {dimension_semantics = [#tpu.dimension_semantics<arbitrary>], iteration_bounds = array<i64: 2>, scalar_prefetch = 0 : i64, scratch_operands = 1 : i64, tpu.core_type = #tpu.core_type<tc>, window_params = [{pipeline_mode = #tpu.pipeline_mode<synchronous>, transform_indices = @transform_0, window_bounds = array<i64: 2, 8, 32>}, {pipeline_mode = #tpu.pipeline_mode<synchronous>, transform_indices = @transform_1, window_bounds = array<i64: 2, 8, 32>}, {pipeline_mode = #tpu.pipeline_mode<synchronous>, transform_indices = @transform_2, window_bounds = array<i64: 8, 8>}, {pipeline_mode = #tpu.pipeline_mode<synchronous>, transform_indices = @transform_3, window_bounds = array<i64: 8, 8>}, {transform_indices = @transform_4, window_bounds = array<i64: 1, 32, 96>}, {transform_indices = @transform_5, window_bounds = array<i64: 1, 1, 96>}, {transform_indices = @transform_6, window_bounds = array<i64: 1, 32, 32>}, {transform_indices = @transform_7, window_bounds = array<i64: 1, 1, 32>}, {transform_indices = @transform_8, window_bounds = array<i64: 1, 32, 32>}, {transform_indices = @transform_9, window_bounds = array<i64: 1, 1, 32>}, {transform_indices = @transform_10, window_bounds = array<i64: 1, 32, 64>}, {transform_indices = @transform_11, window_bounds = array<i64: 1, 1, 64>}, {transform_indices = @transform_12, window_bounds = array<i64: 1, 32, 32>}, {transform_indices = @transform_13, window_bounds = array<i64: 1, 1, 32>}, {transform_indices = @transform_14, window_bounds = array<i64: 1, 3, 8, 32>}, {transform_indices = @transform_15, window_bounds = array<i64: 1, 3, 8, 32>}, {transform_indices = @transform_16, window_bounds = array<i64: 1, 32, 64>}, {transform_indices = @transform_17, window_bounds = array<i64: 1, 1, 64>}, {transform_indices = @transform_18, window_bounds = array<i64: 1, 64, 32>}, {transform_indices = @transform_19, window_bounds = array<i64: 1, 1, 32>}, {pipeline_mode = #tpu.pipeline_mode<synchronous>, transform_indices = @transform_20, window_bounds = array<i64: 2, 8, 32>}]} {
    %c0_i32 = arith.constant 0 : i32
    %0 = arith.cmpi eq, %arg0, %c0_i32 : i32
    %1 = arith.extui %0 : i1 to i32
    %c0_i32_0 = arith.constant 0 : i32
    %2 = arith.cmpi ne, %1, %c0_i32_0 : i32
    scf.if %2 {
      %c0_166 = arith.constant 0 : index
      %c0_167 = arith.constant 0 : index
      %c0_168 = arith.constant 0 : index
      %339 = vector.load %arg1[%c0_166, %c0_167, %c0_168] : memref<2x8x32xf32, #tpu.memory_space<vmem>>, vector<2x8x32xf32>
      %c0_169 = arith.constant 0 : index
      %c0_170 = arith.constant 0 : index
      %c0_171 = arith.constant 0 : index
      %340 = vector.load %arg21[%c0_169, %c0_170, %c0_171] : memref<2x8x32xf32, #tpu.memory_space<vmem>>, vector<2x8x32xf32>
      tpu.vector_store %arg21[%c0_169, %c0_170, %c0_171], %339 {strides = array<i32>} : memref<2x8x32xf32, #tpu.memory_space<vmem>>, vector<2x8x32xf32>,
    } else {
    }
    %c0 = arith.constant 0 : index
    %c0_1 = arith.constant 0 : index
    %c0_2 = arith.constant 0 : index
    %3 = vector.load %arg21[%c0, %c0_1, %c0_2] : memref<2x8x32xf32, #tpu.memory_space<vmem>>, vector<2x8x32xf32>
    %c0_3 = arith.constant 0 : index
    %c0_4 = arith.constant 0 : index
    %c0_5 = arith.constant 0 : index
    %4 = vector.load %arg2[%c0_3, %c0_4, %c0_5] : memref<2x8x32xf32, #tpu.memory_space<vmem>>, vector<2x8x32xf32>
    %c0_6 = arith.constant 0 : index
    %c0_7 = arith.constant 0 : index
    %5 = vector.load %arg3[%c0_6, %c0_7] : memref<8x8xf32, #tpu.memory_space<vmem>>, vector<8x8xf32>
    %c0_8 = arith.constant 0 : index
    %c0_9 = arith.constant 0 : index
    %6 = vector.load %arg4[%c0_8, %c0_9] : memref<8x8xf32, #tpu.memory_space<vmem>>, vector<8x8xf32>
    %cst = arith.constant 8.000000e+00 : f32
    %7 = math.sqrt %cst : f32
    %cst_10 = arith.constant 1.000000e+00 : f32
    %8 = arith.divf %cst_10, %7 : f32
    %9 = vector.shape_cast %3 : vector<2x8x32xf32> to vector<16x32xf32>
    %c0_11 = arith.constant 0 : index
    %c0_12 = arith.constant 0 : index
    %c0_13 = arith.constant 0 : index
    %10 = vector.load %arg5[%c0_11, %c0_12, %c0_13] : memref<1x32x96xbf16, #tpu.memory_space<vmem>>, vector<1x32x96xbf16>
    %11 = vector.shape_cast %10 : vector<1x32x96xbf16> to vector<32x96xbf16>
    %12 = arith.extf %11 : vector<32x96xbf16> to vector<32x96xf32>
    %cst_14 = arith.constant dense<0.000000e+00> : vector<16x96xf32>
    %13 = tpu.matmul %9, %12, %cst_14 {dimension_numbers = #tpu.dot_dimension_numbers<[1], [0], [0], [1], [0, 0, 1, 1], [], []>} : vector<16x32xf32>, vector<32x96xf32>, vector<16x96xf32> -> vector<16x96xf32>
    %c0_15 = arith.constant 0 : index
    %c0_16 = arith.constant 0 : index
    %c0_17 = arith.constant 0 : index
    %14 = vector.load %arg6[%c0_15, %c0_16, %c0_17] : memref<1x1x96xf32, #tpu.memory_space<vmem>>, vector<1x1x96xf32>
    %15 = vector.shape_cast %14 : vector<1x1x96xf32> to vector<1x96xf32>
    %16 = vector.broadcast %15 : vector<1x96xf32> to vector<16x96xf32>
    %17 = arith.addf %13, %16 : vector<16x96xf32>
    %18 = vector.extract_strided_slice %17 {offsets = [0, 0], sizes = [16, 32], strides = [1, 1]} : vector<16x96xf32> to vector<16x32xf32>
    %19 = vector.broadcast %8 : f32 to vector<16x32xf32>
    %20 = arith.mulf %18, %19 : vector<16x32xf32>
    %21 = vector.shape_cast %20 : vector<16x32xf32> to vector<2x8x32xf32>
    %22 = vector.extract_strided_slice %17 {offsets = [0, 32], sizes = [16, 32], strides = [1, 1]} : vector<16x96xf32> to vector<16x32xf32>
    %23 = vector.shape_cast %22 : vector<16x32xf32> to vector<2x8x32xf32>
    %24 = vector.extract_strided_slice %17 {offsets = [0, 64], sizes = [16, 32], strides = [1, 1]} : vector<16x96xf32> to vector<16x32xf32>
    %25 = vector.shape_cast %24 : vector<16x32xf32> to vector<2x8x32xf32>
    %26 = vector.extract_strided_slice %21 {offsets = [0, 0, 0], sizes = [2, 8, 8], strides = [1, 1, 1]} : vector<2x8x32xf32> to vector<2x8x8xf32>
    %27 = vector.extract_strided_slice %23 {offsets = [0, 0, 0], sizes = [2, 8, 8], strides = [1, 1, 1]} : vector<2x8x32xf32> to vector<2x8x8xf32>
    "tpu.trace_start"() <{level = 10 : i32, message = "bqd,bkd->bqk"}> : () -> ()
    %cst_18 = arith.constant dense<0.000000e+00> : vector<2x8x8xf32>
    %28 = tpu.matmul %26, %27, %cst_18 {dimension_numbers = #tpu.dot_dimension_numbers<[2], [2], [1], [1], [0, 0, 0, 1, 1, 1], [0], [0]>} : vector<2x8x8xf32>, vector<2x8x8xf32>, vector<2x8x8xf32> -> vector<2x8x8xf32>
    "tpu.trace_stop"() : () -> ()
    %29 = vector.shape_cast %5 : vector<8x8xf32> to vector<1x8x8xf32>
    %30 = vector.broadcast %29 : vector<1x8x8xf32> to vector<2x8x8xf32>
    %31 = arith.addf %28, %30 : vector<2x8x8xf32>
    %cst_19 = arith.constant dense<0xFF800000> : vector<2x8xf32>
    %32 = vector.multi_reduction <maximumf>, %31, %cst_19 [2] : vector<2x8x8xf32> to vector<2x8xf32>
    %33 = vector.shape_cast %32 : vector<2x8xf32> to vector<2x8x1xf32>
    %34 = vector.broadcast %33 : vector<2x8x1xf32> to vector<2x8x8xf32>
    %35 = arith.subf %31, %34 : vector<2x8x8xf32>
    %36 = math.exp %35 : vector<2x8x8xf32>
    %cst_20 = arith.constant dense<0.000000e+00> : vector<2x8xf32>
    %37 = vector.multi_reduction <add>, %36, %cst_20 [2] : vector<2x8x8xf32> to vector<2x8xf32>
    %38 = vector.shape_cast %37 : vector<2x8xf32> to vector<2x8x1xf32>
    %39 = tpu.reciprocal %38 {approx = true} : vector<2x8x1xf32> -> vector<2x8x1xf32>
    %40 = vector.broadcast %39 : vector<2x8x1xf32> to vector<2x8x8xf32>
    %41 = arith.mulf %36, %40 : vector<2x8x8xf32>
    %42 = vector.extract_strided_slice %25 {offsets = [0, 0, 0], sizes = [2, 8, 8], strides = [1, 1, 1]} : vector<2x8x32xf32> to vector<2x8x8xf32>
    "tpu.trace_start"() <{level = 10 : i32, message = "bqk,bkd->bqd"}> : () -> ()
    %cst_21 = arith.constant dense<0.000000e+00> : vector<2x8x8xf32>
    %43 = tpu.matmul %41, %42, %cst_21 {dimension_numbers = #tpu.dot_dimension_numbers<[2], [1], [1], [2], [0, 0, 0, 1, 1, 2], [0], [0]>} : vector<2x8x8xf32>, vector<2x8x8xf32>, vector<2x8x8xf32> -> vector<2x8x8xf32>
    "tpu.trace_stop"() : () -> ()
    %c0_22 = arith.constant 0 : index
    %c0_23 = arith.constant 0 : index
    %c0_24 = arith.constant 0 : index
    %44 = vector.load %arg22[%c0_22, %c0_23, %c0_24] : memref<2x8x32xf32, #tpu.memory_space<vmem>>, vector<2x8x8xf32>
    tpu.vector_store %arg22[%c0_22, %c0_23, %c0_24], %43 {strides = array<i32>} : memref<2x8x32xf32, #tpu.memory_space<vmem>>, vector<2x8x8xf32>,
    %45 = vector.extract_strided_slice %21 {offsets = [0, 0, 8], sizes = [2, 8, 8], strides = [1, 1, 1]} : vector<2x8x32xf32> to vector<2x8x8xf32>
    %46 = vector.extract_strided_slice %23 {offsets = [0, 0, 8], sizes = [2, 8, 8], strides = [1, 1, 1]} : vector<2x8x32xf32> to vector<2x8x8xf32>
    "tpu.trace_start"() <{level = 10 : i32, message = "bqd,bkd->bqk"}> : () -> ()
    %cst_25 = arith.constant dense<0.000000e+00> : vector<2x8x8xf32>
    %47 = tpu.matmul %45, %46, %cst_25 {dimension_numbers = #tpu.dot_dimension_numbers<[2], [2], [1], [1], [0, 0, 0, 1, 1, 1], [0], [0]>} : vector<2x8x8xf32>, vector<2x8x8xf32>, vector<2x8x8xf32> -> vector<2x8x8xf32>
    "tpu.trace_stop"() : () -> ()
    %48 = vector.shape_cast %5 : vector<8x8xf32> to vector<1x8x8xf32>
    %49 = vector.broadcast %48 : vector<1x8x8xf32> to vector<2x8x8xf32>
    %50 = arith.addf %47, %49 : vector<2x8x8xf32>
    %cst_26 = arith.constant dense<0xFF800000> : vector<2x8xf32>
    %51 = vector.multi_reduction <maximumf>, %50, %cst_26 [2] : vector<2x8x8xf32> to vector<2x8xf32>
    %52 = vector.shape_cast %51 : vector<2x8xf32> to vector<2x8x1xf32>
    %53 = vector.broadcast %52 : vector<2x8x1xf32> to vector<2x8x8xf32>
    %54 = arith.subf %50, %53 : vector<2x8x8xf32>
    %55 = math.exp %54 : vector<2x8x8xf32>
    %cst_27 = arith.constant dense<0.000000e+00> : vector<2x8xf32>
    %56 = vector.multi_reduction <add>, %55, %cst_27 [2] : vector<2x8x8xf32> to vector<2x8xf32>
    %57 = vector.shape_cast %56 : vector<2x8xf32> to vector<2x8x1xf32>
    %58 = tpu.reciprocal %57 {approx = true} : vector<2x8x1xf32> -> vector<2x8x1xf32>
    %59 = vector.broadcast %58 : vector<2x8x1xf32> to vector<2x8x8xf32>
    %60 = arith.mulf %55, %59 : vector<2x8x8xf32>
    %61 = vector.extract_strided_slice %25 {offsets = [0, 0, 8], sizes = [2, 8, 8], strides = [1, 1, 1]} : vector<2x8x32xf32> to vector<2x8x8xf32>
    "tpu.trace_start"() <{level = 10 : i32, message = "bqk,bkd->bqd"}> : () -> ()
    %cst_28 = arith.constant dense<0.000000e+00> : vector<2x8x8xf32>
    %62 = tpu.matmul %60, %61, %cst_28 {dimension_numbers = #tpu.dot_dimension_numbers<[2], [1], [1], [2], [0, 0, 0, 1, 1, 2], [0], [0]>} : vector<2x8x8xf32>, vector<2x8x8xf32>, vector<2x8x8xf32> -> vector<2x8x8xf32>
    "tpu.trace_stop"() : () -> ()
    %c0_29 = arith.constant 0 : index
    %c0_30 = arith.constant 0 : index
    %c8 = arith.constant 8 : index
    %63 = vector.load %arg22[%c0_29, %c0_30, %c8] : memref<2x8x32xf32, #tpu.memory_space<vmem>>, vector<2x8x8xf32>
    tpu.vector_store %arg22[%c0_29, %c0_30, %c8], %62 {strides = array<i32>} : memref<2x8x32xf32, #tpu.memory_space<vmem>>, vector<2x8x8xf32>,
    %64 = vector.extract_strided_slice %21 {offsets = [0, 0, 16], sizes = [2, 8, 8], strides = [1, 1, 1]} : vector<2x8x32xf32> to vector<2x8x8xf32>
    %65 = vector.extract_strided_slice %23 {offsets = [0, 0, 16], sizes = [2, 8, 8], strides = [1, 1, 1]} : vector<2x8x32xf32> to vector<2x8x8xf32>
    "tpu.trace_start"() <{level = 10 : i32, message = "bqd,bkd->bqk"}> : () -> ()
    %cst_31 = arith.constant dense<0.000000e+00> : vector<2x8x8xf32>
    %66 = tpu.matmul %64, %65, %cst_31 {dimension_numbers = #tpu.dot_dimension_numbers<[2], [2], [1], [1], [0, 0, 0, 1, 1, 1], [0], [0]>} : vector<2x8x8xf32>, vector<2x8x8xf32>, vector<2x8x8xf32> -> vector<2x8x8xf32>
    "tpu.trace_stop"() : () -> ()
    %67 = vector.shape_cast %5 : vector<8x8xf32> to vector<1x8x8xf32>
    %68 = vector.broadcast %67 : vector<1x8x8xf32> to vector<2x8x8xf32>
    %69 = arith.addf %66, %68 : vector<2x8x8xf32>
    %cst_32 = arith.constant dense<0xFF800000> : vector<2x8xf32>
    %70 = vector.multi_reduction <maximumf>, %69, %cst_32 [2] : vector<2x8x8xf32> to vector<2x8xf32>
    %71 = vector.shape_cast %70 : vector<2x8xf32> to vector<2x8x1xf32>
    %72 = vector.broadcast %71 : vector<2x8x1xf32> to vector<2x8x8xf32>
    %73 = arith.subf %69, %72 : vector<2x8x8xf32>
    %74 = math.exp %73 : vector<2x8x8xf32>
    %cst_33 = arith.constant dense<0.000000e+00> : vector<2x8xf32>
    %75 = vector.multi_reduction <add>, %74, %cst_33 [2] : vector<2x8x8xf32> to vector<2x8xf32>
    %76 = vector.shape_cast %75 : vector<2x8xf32> to vector<2x8x1xf32>
    %77 = tpu.reciprocal %76 {approx = true} : vector<2x8x1xf32> -> vector<2x8x1xf32>
    %78 = vector.broadcast %77 : vector<2x8x1xf32> to vector<2x8x8xf32>
    %79 = arith.mulf %74, %78 : vector<2x8x8xf32>
    %80 = vector.extract_strided_slice %25 {offsets = [0, 0, 16], sizes = [2, 8, 8], strides = [1, 1, 1]} : vector<2x8x32xf32> to vector<2x8x8xf32>
    "tpu.trace_start"() <{level = 10 : i32, message = "bqk,bkd->bqd"}> : () -> ()
    %cst_34 = arith.constant dense<0.000000e+00> : vector<2x8x8xf32>
    %81 = tpu.matmul %79, %80, %cst_34 {dimension_numbers = #tpu.dot_dimension_numbers<[2], [1], [1], [2], [0, 0, 0, 1, 1, 2], [0], [0]>} : vector<2x8x8xf32>, vector<2x8x8xf32>, vector<2x8x8xf32> -> vector<2x8x8xf32>
    "tpu.trace_stop"() : () -> ()
    %c0_35 = arith.constant 0 : index
    %c0_36 = arith.constant 0 : index
    %c16 = arith.constant 16 : index
    %82 = vector.load %arg22[%c0_35, %c0_36, %c16] : memref<2x8x32xf32, #tpu.memory_space<vmem>>, vector<2x8x8xf32>
    tpu.vector_store %arg22[%c0_35, %c0_36, %c16], %81 {strides = array<i32>} : memref<2x8x32xf32, #tpu.memory_space<vmem>>, vector<2x8x8xf32>,
    %83 = vector.extract_strided_slice %21 {offsets = [0, 0, 24], sizes = [2, 8, 8], strides = [1, 1, 1]} : vector<2x8x32xf32> to vector<2x8x8xf32>
    %84 = vector.extract_strided_slice %23 {offsets = [0, 0, 24], sizes = [2, 8, 8], strides = [1, 1, 1]} : vector<2x8x32xf32> to vector<2x8x8xf32>
    "tpu.trace_start"() <{level = 10 : i32, message = "bqd,bkd->bqk"}> : () -> ()
    %cst_37 = arith.constant dense<0.000000e+00> : vector<2x8x8xf32>
    %85 = tpu.matmul %83, %84, %cst_37 {dimension_numbers = #tpu.dot_dimension_numbers<[2], [2], [1], [1], [0, 0, 0, 1, 1, 1], [0], [0]>} : vector<2x8x8xf32>, vector<2x8x8xf32>, vector<2x8x8xf32> -> vector<2x8x8xf32>
    "tpu.trace_stop"() : () -> ()
    %86 = vector.shape_cast %5 : vector<8x8xf32> to vector<1x8x8xf32>
    %87 = vector.broadcast %86 : vector<1x8x8xf32> to vector<2x8x8xf32>
    %88 = arith.addf %85, %87 : vector<2x8x8xf32>
    %cst_38 = arith.constant dense<0xFF800000> : vector<2x8xf32>
    %89 = vector.multi_reduction <maximumf>, %88, %cst_38 [2] : vector<2x8x8xf32> to vector<2x8xf32>
    %90 = vector.shape_cast %89 : vector<2x8xf32> to vector<2x8x1xf32>
    %91 = vector.broadcast %90 : vector<2x8x1xf32> to vector<2x8x8xf32>
    %92 = arith.subf %88, %91 : vector<2x8x8xf32>
    %93 = math.exp %92 : vector<2x8x8xf32>
    %cst_39 = arith.constant dense<0.000000e+00> : vector<2x8xf32>
    %94 = vector.multi_reduction <add>, %93, %cst_39 [2] : vector<2x8x8xf32> to vector<2x8xf32>
    %95 = vector.shape_cast %94 : vector<2x8xf32> to vector<2x8x1xf32>
    %96 = tpu.reciprocal %95 {approx = true} : vector<2x8x1xf32> -> vector<2x8x1xf32>
    %97 = vector.broadcast %96 : vector<2x8x1xf32> to vector<2x8x8xf32>
    %98 = arith.mulf %93, %97 : vector<2x8x8xf32>
    %99 = vector.extract_strided_slice %25 {offsets = [0, 0, 24], sizes = [2, 8, 8], strides = [1, 1, 1]} : vector<2x8x32xf32> to vector<2x8x8xf32>
    "tpu.trace_start"() <{level = 10 : i32, message = "bqk,bkd->bqd"}> : () -> ()
    %cst_40 = arith.constant dense<0.000000e+00> : vector<2x8x8xf32>
    %100 = tpu.matmul %98, %99, %cst_40 {dimension_numbers = #tpu.dot_dimension_numbers<[2], [1], [1], [2], [0, 0, 0, 1, 1, 2], [0], [0]>} : vector<2x8x8xf32>, vector<2x8x8xf32>, vector<2x8x8xf32> -> vector<2x8x8xf32>
    "tpu.trace_stop"() : () -> ()
    %c0_41 = arith.constant 0 : index
    %c0_42 = arith.constant 0 : index
    %c24 = arith.constant 24 : index
    %101 = vector.load %arg22[%c0_41, %c0_42, %c24] : memref<2x8x32xf32, #tpu.memory_space<vmem>>, vector<2x8x8xf32>
    tpu.vector_store %arg22[%c0_41, %c0_42, %c24], %100 {strides = array<i32>} : memref<2x8x32xf32, #tpu.memory_space<vmem>>, vector<2x8x8xf32>,
    %c0_43 = arith.constant 0 : index
    %c0_44 = arith.constant 0 : index
    %c0_45 = arith.constant 0 : index
    %102 = vector.load %arg22[%c0_43, %c0_44, %c0_45] : memref<2x8x32xf32, #tpu.memory_space<vmem>>, vector<2x8x32xf32>
    %103 = vector.shape_cast %102 : vector<2x8x32xf32> to vector<16x32xf32>
    %c0_46 = arith.constant 0 : index
    %c0_47 = arith.constant 0 : index
    %c0_48 = arith.constant 0 : index
    %104 = vector.load %arg7[%c0_46, %c0_47, %c0_48] : memref<1x32x32xbf16, #tpu.memory_space<vmem>>, vector<1x32x32xbf16>
    %105 = vector.shape_cast %104 : vector<1x32x32xbf16> to vector<32x32xbf16>
    %106 = arith.extf %105 : vector<32x32xbf16> to vector<32x32xf32>
    %cst_49 = arith.constant dense<0.000000e+00> : vector<16x32xf32>
    %107 = tpu.matmul %103, %106, %cst_49 {dimension_numbers = #tpu.dot_dimension_numbers<[1], [0], [0], [1], [0, 0, 1, 1], [], []>} : vector<16x32xf32>, vector<32x32xf32>, vector<16x32xf32> -> vector<16x32xf32>
    %c0_50 = arith.constant 0 : index
    %c0_51 = arith.constant 0 : index
    %c0_52 = arith.constant 0 : index
    %108 = vector.load %arg8[%c0_50, %c0_51, %c0_52] : memref<1x1x32xf32, #tpu.memory_space<vmem>>, vector<1x1x32xf32>
    %109 = vector.shape_cast %108 : vector<1x1x32xf32> to vector<1x32xf32>
    %110 = vector.broadcast %109 : vector<1x32xf32> to vector<16x32xf32>
    %111 = arith.addf %107, %110 : vector<16x32xf32>
    %112 = vector.shape_cast %111 : vector<16x32xf32> to vector<2x8x32xf32>
    %113 = arith.addf %3, %112 : vector<2x8x32xf32>
    %c0_53 = arith.constant 0 : index
    %c0_54 = arith.constant 0 : index
    %c0_55 = arith.constant 0 : index
    %c0_56 = arith.constant 0 : index
    %114 = vector.load %arg15[%c0_53, %c0_54, %c0_55, %c0_56] : memref<1x3x8x32xf32, #tpu.memory_space<vmem>>, vector<1x1x8x32xf32>
    %115 = vector.shape_cast %114 : vector<1x1x8x32xf32> to vector<8x32xf32>
    %c0_57 = arith.constant 0 : index
    %c0_58 = arith.constant 0 : index
    %c0_59 = arith.constant 0 : index
    %c0_60 = arith.constant 0 : index
    %116 = vector.load %arg16[%c0_57, %c0_58, %c0_59, %c0_60] : memref<1x3x8x32xf32, #tpu.memory_space<vmem>>, vector<1x1x8x32xf32>
    %117 = vector.shape_cast %116 : vector<1x1x8x32xf32> to vector<8x32xf32>
    %cst_61 = arith.constant dense<0.000000e+00> : vector<2x8xf32>
    %118 = vector.multi_reduction <add>, %113, %cst_61 [2] : vector<2x8x32xf32> to vector<2x8xf32>
    %119 = vector.shape_cast %118 : vector<2x8xf32> to vector<2x8x1xf32>
    %cst_62 = arith.constant dense<0.000000e+00> : vector<2x1xf32>
    %120 = vector.multi_reduction <add>, %119, %cst_62 [1] : vector<2x8x1xf32> to vector<2x1xf32>
    %121 = vector.shape_cast %120 : vector<2x1xf32> to vector<2x1x1xf32>
    %cst_63 = arith.constant 3.906250e-03 : f32
    %122 = vector.broadcast %cst_63 : f32 to vector<2x1x1xf32>
    %123 = arith.mulf %121, %122 : vector<2x1x1xf32>
    %124 = vector.broadcast %123 : vector<2x1x1xf32> to vector<2x8x32xf32>
    %125 = arith.subf %113, %124 : vector<2x8x32xf32>
    %126 = arith.mulf %125, %125 : vector<2x8x32xf32>
    %cst_64 = arith.constant dense<0.000000e+00> : vector<2x8xf32>
    %127 = vector.multi_reduction <add>, %126, %cst_64 [2] : vector<2x8x32xf32> to vector<2x8xf32>
    %128 = vector.shape_cast %127 : vector<2x8xf32> to vector<2x8x1xf32>
    %cst_65 = arith.constant dense<0.000000e+00> : vector<2x1xf32>
    %129 = vector.multi_reduction <add>, %128, %cst_65 [1] : vector<2x8x1xf32> to vector<2x1xf32>
    %130 = vector.shape_cast %129 : vector<2x1xf32> to vector<2x1x1xf32>
    %cst_66 = arith.constant 3.906250e-03 : f32
    %131 = vector.broadcast %cst_66 : f32 to vector<2x1x1xf32>
    %132 = arith.mulf %130, %131 : vector<2x1x1xf32>
    %cst_67 = arith.constant 9.99999974E-6 : f32
    %133 = vector.broadcast %cst_67 : f32 to vector<2x1x1xf32>
    %134 = arith.addf %132, %133 : vector<2x1x1xf32>
    %135 = math.rsqrt %134 : vector<2x1x1xf32>
    %136 = vector.broadcast %135 : vector<2x1x1xf32> to vector<2x8x32xf32>
    %137 = arith.mulf %125, %136 : vector<2x8x32xf32>
    %138 = vector.shape_cast %115 : vector<8x32xf32> to vector<1x8x32xf32>
    %139 = vector.broadcast %138 : vector<1x8x32xf32> to vector<2x8x32xf32>
    %140 = arith.mulf %137, %139 : vector<2x8x32xf32>
    %141 = vector.shape_cast %117 : vector<8x32xf32> to vector<1x8x32xf32>
    %142 = vector.broadcast %141 : vector<1x8x32xf32> to vector<2x8x32xf32>
    %143 = arith.addf %140, %142 : vector<2x8x32xf32>
    %144 = vector.shape_cast %143 : vector<2x8x32xf32> to vector<16x32xf32>
    %c0_68 = arith.constant 0 : index
    %c0_69 = arith.constant 0 : index
    %c0_70 = arith.constant 0 : index
    %145 = vector.load %arg9[%c0_68, %c0_69, %c0_70] : memref<1x32x32xbf16, #tpu.memory_space<vmem>>, vector<1x32x32xbf16>
    %146 = vector.shape_cast %145 : vector<1x32x32xbf16> to vector<32x32xbf16>
    %147 = arith.extf %146 : vector<32x32xbf16> to vector<32x32xf32>
    %cst_71 = arith.constant dense<0.000000e+00> : vector<16x32xf32>
    %148 = tpu.matmul %144, %147, %cst_71 {dimension_numbers = #tpu.dot_dimension_numbers<[1], [0], [0], [1], [0, 0, 1, 1], [], []>} : vector<16x32xf32>, vector<32x32xf32>, vector<16x32xf32> -> vector<16x32xf32>
    %c0_72 = arith.constant 0 : index
    %c0_73 = arith.constant 0 : index
    %c0_74 = arith.constant 0 : index
    %149 = vector.load %arg10[%c0_72, %c0_73, %c0_74] : memref<1x1x32xf32, #tpu.memory_space<vmem>>, vector<1x1x32xf32>
    %150 = vector.shape_cast %149 : vector<1x1x32xf32> to vector<1x32xf32>
    %151 = vector.broadcast %150 : vector<1x32xf32> to vector<16x32xf32>
    %152 = arith.addf %148, %151 : vector<16x32xf32>
    %153 = vector.broadcast %8 : f32 to vector<16x32xf32>
    %154 = arith.mulf %152, %153 : vector<16x32xf32>
    %155 = vector.shape_cast %4 : vector<2x8x32xf32> to vector<16x32xf32>
    %c0_75 = arith.constant 0 : index
    %c0_76 = arith.constant 0 : index
    %c0_77 = arith.constant 0 : index
    %156 = vector.load %arg11[%c0_75, %c0_76, %c0_77] : memref<1x32x64xbf16, #tpu.memory_space<vmem>>, vector<1x32x64xbf16>
    %157 = vector.shape_cast %156 : vector<1x32x64xbf16> to vector<32x64xbf16>
    %158 = arith.extf %157 : vector<32x64xbf16> to vector<32x64xf32>
    %cst_78 = arith.constant dense<0.000000e+00> : vector<16x64xf32>
    %159 = tpu.matmul %155, %158, %cst_78 {dimension_numbers = #tpu.dot_dimension_numbers<[1], [0], [0], [1], [0, 0, 1, 1], [], []>} : vector<16x32xf32>, vector<32x64xf32>, vector<16x64xf32> -> vector<16x64xf32>
    %c0_79 = arith.constant 0 : index
    %c0_80 = arith.constant 0 : index
    %c0_81 = arith.constant 0 : index
    %160 = vector.load %arg12[%c0_79, %c0_80, %c0_81] : memref<1x1x64xf32, #tpu.memory_space<vmem>>, vector<1x1x64xf32>
    %161 = vector.shape_cast %160 : vector<1x1x64xf32> to vector<1x64xf32>
    %162 = vector.broadcast %161 : vector<1x64xf32> to vector<16x64xf32>
    %163 = arith.addf %159, %162 : vector<16x64xf32>
    %164 = vector.shape_cast %154 : vector<16x32xf32> to vector<2x8x32xf32>
    %165 = vector.extract_strided_slice %163 {offsets = [0, 0], sizes = [16, 32], strides = [1, 1]} : vector<16x64xf32> to vector<16x32xf32>
    %166 = vector.shape_cast %165 : vector<16x32xf32> to vector<2x8x32xf32>
    %167 = vector.extract_strided_slice %163 {offsets = [0, 32], sizes = [16, 32], strides = [1, 1]} : vector<16x64xf32> to vector<16x32xf32>
    %168 = vector.shape_cast %167 : vector<16x32xf32> to vector<2x8x32xf32>
    %169 = vector.extract_strided_slice %164 {offsets = [0, 0, 0], sizes = [2, 8, 8], strides = [1, 1, 1]} : vector<2x8x32xf32> to vector<2x8x8xf32>
    %170 = vector.extract_strided_slice %166 {offsets = [0, 0, 0], sizes = [2, 8, 8], strides = [1, 1, 1]} : vector<2x8x32xf32> to vector<2x8x8xf32>
    "tpu.trace_start"() <{level = 10 : i32, message = "bqd,bkd->bqk"}> : () -> ()
    %cst_82 = arith.constant dense<0.000000e+00> : vector<2x8x8xf32>
    %171 = tpu.matmul %169, %170, %cst_82 {dimension_numbers = #tpu.dot_dimension_numbers<[2], [2], [1], [1], [0, 0, 0, 1, 1, 1], [0], [0]>} : vector<2x8x8xf32>, vector<2x8x8xf32>, vector<2x8x8xf32> -> vector<2x8x8xf32>
    "tpu.trace_stop"() : () -> ()
    %172 = vector.shape_cast %6 : vector<8x8xf32> to vector<1x8x8xf32>
    %173 = vector.broadcast %172 : vector<1x8x8xf32> to vector<2x8x8xf32>
    %174 = arith.addf %171, %173 : vector<2x8x8xf32>
    %cst_83 = arith.constant dense<0xFF800000> : vector<2x8xf32>
    %175 = vector.multi_reduction <maximumf>, %174, %cst_83 [2] : vector<2x8x8xf32> to vector<2x8xf32>
    %176 = vector.shape_cast %175 : vector<2x8xf32> to vector<2x8x1xf32>
    %177 = vector.broadcast %176 : vector<2x8x1xf32> to vector<2x8x8xf32>
    %178 = arith.subf %174, %177 : vector<2x8x8xf32>
    %179 = math.exp %178 : vector<2x8x8xf32>
    %cst_84 = arith.constant dense<0.000000e+00> : vector<2x8xf32>
    %180 = vector.multi_reduction <add>, %179, %cst_84 [2] : vector<2x8x8xf32> to vector<2x8xf32>
    %181 = vector.shape_cast %180 : vector<2x8xf32> to vector<2x8x1xf32>
    %182 = tpu.reciprocal %181 {approx = true} : vector<2x8x1xf32> -> vector<2x8x1xf32>
    %183 = vector.broadcast %182 : vector<2x8x1xf32> to vector<2x8x8xf32>
    %184 = arith.mulf %179, %183 : vector<2x8x8xf32>
    %185 = vector.extract_strided_slice %168 {offsets = [0, 0, 0], sizes = [2, 8, 8], strides = [1, 1, 1]} : vector<2x8x32xf32> to vector<2x8x8xf32>
    "tpu.trace_start"() <{level = 10 : i32, message = "bqk,bkd->bqd"}> : () -> ()
    %cst_85 = arith.constant dense<0.000000e+00> : vector<2x8x8xf32>
    %186 = tpu.matmul %184, %185, %cst_85 {dimension_numbers = #tpu.dot_dimension_numbers<[2], [1], [1], [2], [0, 0, 0, 1, 1, 2], [0], [0]>} : vector<2x8x8xf32>, vector<2x8x8xf32>, vector<2x8x8xf32> -> vector<2x8x8xf32>
    "tpu.trace_stop"() : () -> ()
    %c0_86 = arith.constant 0 : index
    %c0_87 = arith.constant 0 : index
    %c0_88 = arith.constant 0 : index
    %187 = vector.load %arg22[%c0_86, %c0_87, %c0_88] : memref<2x8x32xf32, #tpu.memory_space<vmem>>, vector<2x8x8xf32>
    tpu.vector_store %arg22[%c0_86, %c0_87, %c0_88], %186 {strides = array<i32>} : memref<2x8x32xf32, #tpu.memory_space<vmem>>, vector<2x8x8xf32>,
    %188 = vector.extract_strided_slice %164 {offsets = [0, 0, 8], sizes = [2, 8, 8], strides = [1, 1, 1]} : vector<2x8x32xf32> to vector<2x8x8xf32>
    %189 = vector.extract_strided_slice %166 {offsets = [0, 0, 8], sizes = [2, 8, 8], strides = [1, 1, 1]} : vector<2x8x32xf32> to vector<2x8x8xf32>
    "tpu.trace_start"() <{level = 10 : i32, message = "bqd,bkd->bqk"}> : () -> ()
    %cst_89 = arith.constant dense<0.000000e+00> : vector<2x8x8xf32>
    %190 = tpu.matmul %188, %189, %cst_89 {dimension_numbers = #tpu.dot_dimension_numbers<[2], [2], [1], [1], [0, 0, 0, 1, 1, 1], [0], [0]>} : vector<2x8x8xf32>, vector<2x8x8xf32>, vector<2x8x8xf32> -> vector<2x8x8xf32>
    "tpu.trace_stop"() : () -> ()
    %191 = vector.shape_cast %6 : vector<8x8xf32> to vector<1x8x8xf32>
    %192 = vector.broadcast %191 : vector<1x8x8xf32> to vector<2x8x8xf32>
    %193 = arith.addf %190, %192 : vector<2x8x8xf32>
    %cst_90 = arith.constant dense<0xFF800000> : vector<2x8xf32>
    %194 = vector.multi_reduction <maximumf>, %193, %cst_90 [2] : vector<2x8x8xf32> to vector<2x8xf32>
    %195 = vector.shape_cast %194 : vector<2x8xf32> to vector<2x8x1xf32>
    %196 = vector.broadcast %195 : vector<2x8x1xf32> to vector<2x8x8xf32>
    %197 = arith.subf %193, %196 : vector<2x8x8xf32>
    %198 = math.exp %197 : vector<2x8x8xf32>
    %cst_91 = arith.constant dense<0.000000e+00> : vector<2x8xf32>
    %199 = vector.multi_reduction <add>, %198, %cst_91 [2] : vector<2x8x8xf32> to vector<2x8xf32>
    %200 = vector.shape_cast %199 : vector<2x8xf32> to vector<2x8x1xf32>
    %201 = tpu.reciprocal %200 {approx = true} : vector<2x8x1xf32> -> vector<2x8x1xf32>
    %202 = vector.broadcast %201 : vector<2x8x1xf32> to vector<2x8x8xf32>
    %203 = arith.mulf %198, %202 : vector<2x8x8xf32>
    %204 = vector.extract_strided_slice %168 {offsets = [0, 0, 8], sizes = [2, 8, 8], strides = [1, 1, 1]} : vector<2x8x32xf32> to vector<2x8x8xf32>
    "tpu.trace_start"() <{level = 10 : i32, message = "bqk,bkd->bqd"}> : () -> ()
    %cst_92 = arith.constant dense<0.000000e+00> : vector<2x8x8xf32>
    %205 = tpu.matmul %203, %204, %cst_92 {dimension_numbers = #tpu.dot_dimension_numbers<[2], [1], [1], [2], [0, 0, 0, 1, 1, 2], [0], [0]>} : vector<2x8x8xf32>, vector<2x8x8xf32>, vector<2x8x8xf32> -> vector<2x8x8xf32>
    "tpu.trace_stop"() : () -> ()
    %c0_93 = arith.constant 0 : index
    %c0_94 = arith.constant 0 : index
    %c8_95 = arith.constant 8 : index
    %206 = vector.load %arg22[%c0_93, %c0_94, %c8_95] : memref<2x8x32xf32, #tpu.memory_space<vmem>>, vector<2x8x8xf32>
    tpu.vector_store %arg22[%c0_93, %c0_94, %c8_95], %205 {strides = array<i32>} : memref<2x8x32xf32, #tpu.memory_space<vmem>>, vector<2x8x8xf32>,
    %207 = vector.extract_strided_slice %164 {offsets = [0, 0, 16], sizes = [2, 8, 8], strides = [1, 1, 1]} : vector<2x8x32xf32> to vector<2x8x8xf32>
    %208 = vector.extract_strided_slice %166 {offsets = [0, 0, 16], sizes = [2, 8, 8], strides = [1, 1, 1]} : vector<2x8x32xf32> to vector<2x8x8xf32>
    "tpu.trace_start"() <{level = 10 : i32, message = "bqd,bkd->bqk"}> : () -> ()
    %cst_96 = arith.constant dense<0.000000e+00> : vector<2x8x8xf32>
    %209 = tpu.matmul %207, %208, %cst_96 {dimension_numbers = #tpu.dot_dimension_numbers<[2], [2], [1], [1], [0, 0, 0, 1, 1, 1], [0], [0]>} : vector<2x8x8xf32>, vector<2x8x8xf32>, vector<2x8x8xf32> -> vector<2x8x8xf32>
    "tpu.trace_stop"() : () -> ()
    %210 = vector.shape_cast %6 : vector<8x8xf32> to vector<1x8x8xf32>
    %211 = vector.broadcast %210 : vector<1x8x8xf32> to vector<2x8x8xf32>
    %212 = arith.addf %209, %211 : vector<2x8x8xf32>
    %cst_97 = arith.constant dense<0xFF800000> : vector<2x8xf32>
    %213 = vector.multi_reduction <maximumf>, %212, %cst_97 [2] : vector<2x8x8xf32> to vector<2x8xf32>
    %214 = vector.shape_cast %213 : vector<2x8xf32> to vector<2x8x1xf32>
    %215 = vector.broadcast %214 : vector<2x8x1xf32> to vector<2x8x8xf32>
    %216 = arith.subf %212, %215 : vector<2x8x8xf32>
    %217 = math.exp %216 : vector<2x8x8xf32>
    %cst_98 = arith.constant dense<0.000000e+00> : vector<2x8xf32>
    %218 = vector.multi_reduction <add>, %217, %cst_98 [2] : vector<2x8x8xf32> to vector<2x8xf32>
    %219 = vector.shape_cast %218 : vector<2x8xf32> to vector<2x8x1xf32>
    %220 = tpu.reciprocal %219 {approx = true} : vector<2x8x1xf32> -> vector<2x8x1xf32>
    %221 = vector.broadcast %220 : vector<2x8x1xf32> to vector<2x8x8xf32>
    %222 = arith.mulf %217, %221 : vector<2x8x8xf32>
    %223 = vector.extract_strided_slice %168 {offsets = [0, 0, 16], sizes = [2, 8, 8], strides = [1, 1, 1]} : vector<2x8x32xf32> to vector<2x8x8xf32>
    "tpu.trace_start"() <{level = 10 : i32, message = "bqk,bkd->bqd"}> : () -> ()
    %cst_99 = arith.constant dense<0.000000e+00> : vector<2x8x8xf32>
    %224 = tpu.matmul %222, %223, %cst_99 {dimension_numbers = #tpu.dot_dimension_numbers<[2], [1], [1], [2], [0, 0, 0, 1, 1, 2], [0], [0]>} : vector<2x8x8xf32>, vector<2x8x8xf32>, vector<2x8x8xf32> -> vector<2x8x8xf32>
    "tpu.trace_stop"() : () -> ()
    %c0_100 = arith.constant 0 : index
    %c0_101 = arith.constant 0 : index
    %c16_102 = arith.constant 16 : index
    %225 = vector.load %arg22[%c0_100, %c0_101, %c16_102] : memref<2x8x32xf32, #tpu.memory_space<vmem>>, vector<2x8x8xf32>
    tpu.vector_store %arg22[%c0_100, %c0_101, %c16_102], %224 {strides = array<i32>} : memref<2x8x32xf32, #tpu.memory_space<vmem>>, vector<2x8x8xf32>,
    %226 = vector.extract_strided_slice %164 {offsets = [0, 0, 24], sizes = [2, 8, 8], strides = [1, 1, 1]} : vector<2x8x32xf32> to vector<2x8x8xf32>
    %227 = vector.extract_strided_slice %166 {offsets = [0, 0, 24], sizes = [2, 8, 8], strides = [1, 1, 1]} : vector<2x8x32xf32> to vector<2x8x8xf32>
    "tpu.trace_start"() <{level = 10 : i32, message = "bqd,bkd->bqk"}> : () -> ()
    %cst_103 = arith.constant dense<0.000000e+00> : vector<2x8x8xf32>
    %228 = tpu.matmul %226, %227, %cst_103 {dimension_numbers = #tpu.dot_dimension_numbers<[2], [2], [1], [1], [0, 0, 0, 1, 1, 1], [0], [0]>} : vector<2x8x8xf32>, vector<2x8x8xf32>, vector<2x8x8xf32> -> vector<2x8x8xf32>
    "tpu.trace_stop"() : () -> ()
    %229 = vector.shape_cast %6 : vector<8x8xf32> to vector<1x8x8xf32>
    %230 = vector.broadcast %229 : vector<1x8x8xf32> to vector<2x8x8xf32>
    %231 = arith.addf %228, %230 : vector<2x8x8xf32>
    %cst_104 = arith.constant dense<0xFF800000> : vector<2x8xf32>
    %232 = vector.multi_reduction <maximumf>, %231, %cst_104 [2] : vector<2x8x8xf32> to vector<2x8xf32>
    %233 = vector.shape_cast %232 : vector<2x8xf32> to vector<2x8x1xf32>
    %234 = vector.broadcast %233 : vector<2x8x1xf32> to vector<2x8x8xf32>
    %235 = arith.subf %231, %234 : vector<2x8x8xf32>
    %236 = math.exp %235 : vector<2x8x8xf32>
    %cst_105 = arith.constant dense<0.000000e+00> : vector<2x8xf32>
    %237 = vector.multi_reduction <add>, %236, %cst_105 [2] : vector<2x8x8xf32> to vector<2x8xf32>
    %238 = vector.shape_cast %237 : vector<2x8xf32> to vector<2x8x1xf32>
    %239 = tpu.reciprocal %238 {approx = true} : vector<2x8x1xf32> -> vector<2x8x1xf32>
    %240 = vector.broadcast %239 : vector<2x8x1xf32> to vector<2x8x8xf32>
    %241 = arith.mulf %236, %240 : vector<2x8x8xf32>
    %242 = vector.extract_strided_slice %168 {offsets = [0, 0, 24], sizes = [2, 8, 8], strides = [1, 1, 1]} : vector<2x8x32xf32> to vector<2x8x8xf32>
    "tpu.trace_start"() <{level = 10 : i32, message = "bqk,bkd->bqd"}> : () -> ()
    %cst_106 = arith.constant dense<0.000000e+00> : vector<2x8x8xf32>
    %243 = tpu.matmul %241, %242, %cst_106 {dimension_numbers = #tpu.dot_dimension_numbers<[2], [1], [1], [2], [0, 0, 0, 1, 1, 2], [0], [0]>} : vector<2x8x8xf32>, vector<2x8x8xf32>, vector<2x8x8xf32> -> vector<2x8x8xf32>
    "tpu.trace_stop"() : () -> ()
    %c0_107 = arith.constant 0 : index
    %c0_108 = arith.constant 0 : index
    %c24_109 = arith.constant 24 : index
    %244 = vector.load %arg22[%c0_107, %c0_108, %c24_109] : memref<2x8x32xf32, #tpu.memory_space<vmem>>, vector<2x8x8xf32>
    tpu.vector_store %arg22[%c0_107, %c0_108, %c24_109], %243 {strides = array<i32>} : memref<2x8x32xf32, #tpu.memory_space<vmem>>, vector<2x8x8xf32>,
    %c0_110 = arith.constant 0 : index
    %c0_111 = arith.constant 0 : index
    %c0_112 = arith.constant 0 : index
    %245 = vector.load %arg22[%c0_110, %c0_111, %c0_112] : memref<2x8x32xf32, #tpu.memory_space<vmem>>, vector<2x8x32xf32>
    %246 = vector.shape_cast %245 : vector<2x8x32xf32> to vector<16x32xf32>
    %c0_113 = arith.constant 0 : index
    %c0_114 = arith.constant 0 : index
    %c0_115 = arith.constant 0 : index
    %247 = vector.load %arg13[%c0_113, %c0_114, %c0_115] : memref<1x32x32xbf16, #tpu.memory_space<vmem>>, vector<1x32x32xbf16>
    %248 = vector.shape_cast %247 : vector<1x32x32xbf16> to vector<32x32xbf16>
    %249 = arith.extf %248 : vector<32x32xbf16> to vector<32x32xf32>
    %cst_116 = arith.constant dense<0.000000e+00> : vector<16x32xf32>
    %250 = tpu.matmul %246, %249, %cst_116 {dimension_numbers = #tpu.dot_dimension_numbers<[1], [0], [0], [1], [0, 0, 1, 1], [], []>} : vector<16x32xf32>, vector<32x32xf32>, vector<16x32xf32> -> vector<16x32xf32>
    %c0_117 = arith.constant 0 : index
    %c0_118 = arith.constant 0 : index
    %c0_119 = arith.constant 0 : index
    %251 = vector.load %arg14[%c0_117, %c0_118, %c0_119] : memref<1x1x32xf32, #tpu.memory_space<vmem>>, vector<1x1x32xf32>
    %252 = vector.shape_cast %251 : vector<1x1x32xf32> to vector<1x32xf32>
    %253 = vector.broadcast %252 : vector<1x32xf32> to vector<16x32xf32>
    %254 = arith.addf %250, %253 : vector<16x32xf32>
    %255 = vector.shape_cast %254 : vector<16x32xf32> to vector<2x8x32xf32>
    %256 = arith.addf %143, %255 : vector<2x8x32xf32>
    %c0_120 = arith.constant 0 : index
    %c1 = arith.constant 1 : index
    %c0_121 = arith.constant 0 : index
    %c0_122 = arith.constant 0 : index
    %257 = vector.load %arg15[%c0_120, %c1, %c0_121, %c0_122] : memref<1x3x8x32xf32, #tpu.memory_space<vmem>>, vector<1x1x8x32xf32>
    %258 = vector.shape_cast %257 : vector<1x1x8x32xf32> to vector<8x32xf32>
    %c0_123 = arith.constant 0 : index
    %c1_124 = arith.constant 1 : index
    %c0_125 = arith.constant 0 : index
    %c0_126 = arith.constant 0 : index
    %259 = vector.load %arg16[%c0_123, %c1_124, %c0_125, %c0_126] : memref<1x3x8x32xf32, #tpu.memory_space<vmem>>, vector<1x1x8x32xf32>
    %260 = vector.shape_cast %259 : vector<1x1x8x32xf32> to vector<8x32xf32>
    %cst_127 = arith.constant dense<0.000000e+00> : vector<2x8xf32>
    %261 = vector.multi_reduction <add>, %256, %cst_127 [2] : vector<2x8x32xf32> to vector<2x8xf32>
    %262 = vector.shape_cast %261 : vector<2x8xf32> to vector<2x8x1xf32>
    %cst_128 = arith.constant dense<0.000000e+00> : vector<2x1xf32>
    %263 = vector.multi_reduction <add>, %262, %cst_128 [1] : vector<2x8x1xf32> to vector<2x1xf32>
    %264 = vector.shape_cast %263 : vector<2x1xf32> to vector<2x1x1xf32>
    %cst_129 = arith.constant 3.906250e-03 : f32
    %265 = vector.broadcast %cst_129 : f32 to vector<2x1x1xf32>
    %266 = arith.mulf %264, %265 : vector<2x1x1xf32>
    %267 = vector.broadcast %266 : vector<2x1x1xf32> to vector<2x8x32xf32>
    %268 = arith.subf %256, %267 : vector<2x8x32xf32>
    %269 = arith.mulf %268, %268 : vector<2x8x32xf32>
    %cst_130 = arith.constant dense<0.000000e+00> : vector<2x8xf32>
    %270 = vector.multi_reduction <add>, %269, %cst_130 [2] : vector<2x8x32xf32> to vector<2x8xf32>
    %271 = vector.shape_cast %270 : vector<2x8xf32> to vector<2x8x1xf32>
    %cst_131 = arith.constant dense<0.000000e+00> : vector<2x1xf32>
    %272 = vector.multi_reduction <add>, %271, %cst_131 [1] : vector<2x8x1xf32> to vector<2x1xf32>
    %273 = vector.shape_cast %272 : vector<2x1xf32> to vector<2x1x1xf32>
    %cst_132 = arith.constant 3.906250e-03 : f32
    %274 = vector.broadcast %cst_132 : f32 to vector<2x1x1xf32>
    %275 = arith.mulf %273, %274 : vector<2x1x1xf32>
    %cst_133 = arith.constant 9.99999974E-6 : f32
    %276 = vector.broadcast %cst_133 : f32 to vector<2x1x1xf32>
    %277 = arith.addf %275, %276 : vector<2x1x1xf32>
    %278 = math.rsqrt %277 : vector<2x1x1xf32>
    %279 = vector.broadcast %278 : vector<2x1x1xf32> to vector<2x8x32xf32>
    %280 = arith.mulf %268, %279 : vector<2x8x32xf32>
    %281 = vector.shape_cast %258 : vector<8x32xf32> to vector<1x8x32xf32>
    %282 = vector.broadcast %281 : vector<1x8x32xf32> to vector<2x8x32xf32>
    %283 = arith.mulf %280, %282 : vector<2x8x32xf32>
    %284 = vector.shape_cast %260 : vector<8x32xf32> to vector<1x8x32xf32>
    %285 = vector.broadcast %284 : vector<1x8x32xf32> to vector<2x8x32xf32>
    %286 = arith.addf %283, %285 : vector<2x8x32xf32>
    %287 = vector.shape_cast %286 : vector<2x8x32xf32> to vector<16x32xf32>
    %c0_134 = arith.constant 0 : index
    %c0_135 = arith.constant 0 : index
    %c0_136 = arith.constant 0 : index
    %288 = vector.load %arg17[%c0_134, %c0_135, %c0_136] : memref<1x32x64xbf16, #tpu.memory_space<vmem>>, vector<1x32x64xbf16>
    %289 = vector.shape_cast %288 : vector<1x32x64xbf16> to vector<32x64xbf16>
    %290 = arith.extf %289 : vector<32x64xbf16> to vector<32x64xf32>
    %cst_137 = arith.constant dense<0.000000e+00> : vector<16x64xf32>
    %291 = tpu.matmul %287, %290, %cst_137 {dimension_numbers = #tpu.dot_dimension_numbers<[1], [0], [0], [1], [0, 0, 1, 1], [], []>} : vector<16x32xf32>, vector<32x64xf32>, vector<16x64xf32> -> vector<16x64xf32>
    %c0_138 = arith.constant 0 : index
    %c0_139 = arith.constant 0 : index
    %c0_140 = arith.constant 0 : index
    %292 = vector.load %arg18[%c0_138, %c0_139, %c0_140] : memref<1x1x64xf32, #tpu.memory_space<vmem>>, vector<1x1x64xf32>
    %293 = vector.shape_cast %292 : vector<1x1x64xf32> to vector<1x64xf32>
    %294 = vector.broadcast %293 : vector<1x64xf32> to vector<16x64xf32>
    %295 = arith.addf %291, %294 : vector<16x64xf32>
    %cst_141 = arith.constant 0.000000e+00 : f32
    %296 = vector.broadcast %cst_141 : f32 to vector<16x64xf32>
    %297 = arith.maximumf %295, %296 : vector<16x64xf32>
    %c0_142 = arith.constant 0 : index
    %c0_143 = arith.constant 0 : index
    %c0_144 = arith.constant 0 : index
    %298 = vector.load %arg19[%c0_142, %c0_143, %c0_144] : memref<1x64x32xbf16, #tpu.memory_space<vmem>>, vector<1x64x32xbf16>
    %299 = vector.shape_cast %298 : vector<1x64x32xbf16> to vector<64x32xbf16>
    %300 = arith.extf %299 : vector<64x32xbf16> to vector<64x32xf32>
    %cst_145 = arith.constant dense<0.000000e+00> : vector<16x32xf32>
    %301 = tpu.matmul %297, %300, %cst_145 {dimension_numbers = #tpu.dot_dimension_numbers<[1], [0], [0], [1], [0, 0, 1, 1], [], []>} : vector<16x64xf32>, vector<64x32xf32>, vector<16x32xf32> -> vector<16x32xf32>
    %c0_146 = arith.constant 0 : index
    %c0_147 = arith.constant 0 : index
    %c0_148 = arith.constant 0 : index
    %302 = vector.load %arg20[%c0_146, %c0_147, %c0_148] : memref<1x1x32xf32, #tpu.memory_space<vmem>>, vector<1x1x32xf32>
    %303 = vector.shape_cast %302 : vector<1x1x32xf32> to vector<1x32xf32>
    %304 = vector.broadcast %303 : vector<1x32xf32> to vector<16x32xf32>
    %305 = arith.addf %301, %304 : vector<16x32xf32>
    %306 = vector.shape_cast %305 : vector<16x32xf32> to vector<2x8x32xf32>
    %307 = arith.addf %286, %306 : vector<2x8x32xf32>
    %c0_149 = arith.constant 0 : index
    %c2 = arith.constant 2 : index
    %c0_150 = arith.constant 0 : index
    %c0_151 = arith.constant 0 : index
    %308 = vector.load %arg15[%c0_149, %c2, %c0_150, %c0_151] : memref<1x3x8x32xf32, #tpu.memory_space<vmem>>, vector<1x1x8x32xf32>
    %309 = vector.shape_cast %308 : vector<1x1x8x32xf32> to vector<8x32xf32>
    %c0_152 = arith.constant 0 : index
    %c2_153 = arith.constant 2 : index
    %c0_154 = arith.constant 0 : index
    %c0_155 = arith.constant 0 : index
    %310 = vector.load %arg16[%c0_152, %c2_153, %c0_154, %c0_155] : memref<1x3x8x32xf32, #tpu.memory_space<vmem>>, vector<1x1x8x32xf32>
    %311 = vector.shape_cast %310 : vector<1x1x8x32xf32> to vector<8x32xf32>
    %cst_156 = arith.constant dense<0.000000e+00> : vector<2x8xf32>
    %312 = vector.multi_reduction <add>, %307, %cst_156 [2] : vector<2x8x32xf32> to vector<2x8xf32>
    %313 = vector.shape_cast %312 : vector<2x8xf32> to vector<2x8x1xf32>
    %cst_157 = arith.constant dense<0.000000e+00> : vector<2x1xf32>
    %314 = vector.multi_reduction <add>, %313, %cst_157 [1] : vector<2x8x1xf32> to vector<2x1xf32>
    %315 = vector.shape_cast %314 : vector<2x1xf32> to vector<2x1x1xf32>
    %cst_158 = arith.constant 3.906250e-03 : f32
    %316 = vector.broadcast %cst_158 : f32 to vector<2x1x1xf32>
    %317 = arith.mulf %315, %316 : vector<2x1x1xf32>
    %318 = vector.broadcast %317 : vector<2x1x1xf32> to vector<2x8x32xf32>
    %319 = arith.subf %307, %318 : vector<2x8x32xf32>
    %320 = arith.mulf %319, %319 : vector<2x8x32xf32>
    %cst_159 = arith.constant dense<0.000000e+00> : vector<2x8xf32>
    %321 = vector.multi_reduction <add>, %320, %cst_159 [2] : vector<2x8x32xf32> to vector<2x8xf32>
    %322 = vector.shape_cast %321 : vector<2x8xf32> to vector<2x8x1xf32>
    %cst_160 = arith.constant dense<0.000000e+00> : vector<2x1xf32>
    %323 = vector.multi_reduction <add>, %322, %cst_160 [1] : vector<2x8x1xf32> to vector<2x1xf32>
    %324 = vector.shape_cast %323 : vector<2x1xf32> to vector<2x1x1xf32>
    %cst_161 = arith.constant 3.906250e-03 : f32
    %325 = vector.broadcast %cst_161 : f32 to vector<2x1x1xf32>
    %326 = arith.mulf %324, %325 : vector<2x1x1xf32>
    %cst_162 = arith.constant 9.99999974E-6 : f32
    %327 = vector.broadcast %cst_162 : f32 to vector<2x1x1xf32>
    %328 = arith.addf %326, %327 : vector<2x1x1xf32>
    %329 = math.rsqrt %328 : vector<2x1x1xf32>
    %330 = vector.broadcast %329 : vector<2x1x1xf32> to vector<2x8x32xf32>
    %331 = arith.mulf %319, %330 : vector<2x8x32xf32>
    %332 = vector.shape_cast %309 : vector<8x32xf32> to vector<1x8x32xf32>
    %333 = vector.broadcast %332 : vector<1x8x32xf32> to vector<2x8x32xf32>
    %334 = arith.mulf %331, %333 : vector<2x8x32xf32>
    %335 = vector.shape_cast %311 : vector<8x32xf32> to vector<1x8x32xf32>
    %336 = vector.broadcast %335 : vector<1x8x32xf32> to vector<2x8x32xf32>
    %337 = arith.addf %334, %336 : vector<2x8x32xf32>
    %c0_163 = arith.constant 0 : index
    %c0_164 = arith.constant 0 : index
    %c0_165 = arith.constant 0 : index
    %338 = vector.load %arg21[%c0_163, %c0_164, %c0_165] : memref<2x8x32xf32, #tpu.memory_space<vmem>>, vector<2x8x32xf32>
    tpu.vector_store %arg21[%c0_163, %c0_164, %c0_165], %337 {strides = array<i32>} : memref<2x8x32xf32, #tpu.memory_space<vmem>>, vector<2x8x32xf32>,
    return
  }
  func.func @transform_0(%arg0: i32) -> (i32, i32, i32) {
    %c0_i32 = arith.constant 0 : i32
    %c0_i32_0 = arith.constant 0 : i32
    %c0_i32_1 = arith.constant 0 : i32
    %c0_i32_2 = arith.constant 0 : i32
    return %c0_i32, %c0_i32_0, %c0_i32_1 : i32, i32, i32
  }
  func.func @transform_1(%arg0: i32) -> (i32, i32, i32) {
    %c0_i32 = arith.constant 0 : i32
    %c0_i32_0 = arith.constant 0 : i32
    %c0_i32_1 = arith.constant 0 : i32
    %c0_i32_2 = arith.constant 0 : i32
    return %c0_i32, %c0_i32_0, %c0_i32_1 : i32, i32, i32
  }
  func.func @transform_2(%arg0: i32) -> (i32, i32) {
    %c0_i32 = arith.constant 0 : i32
    %c0_i32_0 = arith.constant 0 : i32
    %c0_i32_1 = arith.constant 0 : i32
    return %c0_i32, %c0_i32_0 : i32, i32
  }
  func.func @transform_3(%arg0: i32) -> (i32, i32) {
    %c0_i32 = arith.constant 0 : i32
    %c0_i32_0 = arith.constant 0 : i32
    %c0_i32_1 = arith.constant 0 : i32
    return %c0_i32, %c0_i32_0 : i32, i32
  }
  func.func @transform_4(%arg0: i32) -> (i32, i32, i32) {
    %c0_i32 = arith.constant 0 : i32
    %c0_i32_0 = arith.constant 0 : i32
    %c0_i32_1 = arith.constant 0 : i32
    return %arg0, %c0_i32, %c0_i32_0 : i32, i32, i32
  }
  func.func @transform_5(%arg0: i32) -> (i32, i32, i32) {
    %c0_i32 = arith.constant 0 : i32
    %c0_i32_0 = arith.constant 0 : i32
    %c0_i32_1 = arith.constant 0 : i32
    return %arg0, %c0_i32, %c0_i32_0 : i32, i32, i32
  }
  func.func @transform_6(%arg0: i32) -> (i32, i32, i32) {
    %c0_i32 = arith.constant 0 : i32
    %c0_i32_0 = arith.constant 0 : i32
    %c0_i32_1 = arith.constant 0 : i32
    return %arg0, %c0_i32, %c0_i32_0 : i32, i32, i32
  }
  func.func @transform_7(%arg0: i32) -> (i32, i32, i32) {
    %c0_i32 = arith.constant 0 : i32
    %c0_i32_0 = arith.constant 0 : i32
    %c0_i32_1 = arith.constant 0 : i32
    return %arg0, %c0_i32, %c0_i32_0 : i32, i32, i32
  }
  func.func @transform_8(%arg0: i32) -> (i32, i32, i32) {
    %c0_i32 = arith.constant 0 : i32
    %c0_i32_0 = arith.constant 0 : i32
    %c0_i32_1 = arith.constant 0 : i32
    return %arg0, %c0_i32, %c0_i32_0 : i32, i32, i32
  }
  func.func @transform_9(%arg0: i32) -> (i32, i32, i32) {
    %c0_i32 = arith.constant 0 : i32
    %c0_i32_0 = arith.constant 0 : i32
    %c0_i32_1 = arith.constant 0 : i32
    return %arg0, %c0_i32, %c0_i32_0 : i32, i32, i32
  }
  func.func @transform_10(%arg0: i32) -> (i32, i32, i32) {
    %c0_i32 = arith.constant 0 : i32
    %c0_i32_0 = arith.constant 0 : i32
    %c0_i32_1 = arith.constant 0 : i32
    return %arg0, %c0_i32, %c0_i32_0 : i32, i32, i32
  }
  func.func @transform_11(%arg0: i32) -> (i32, i32, i32) {
    %c0_i32 = arith.constant 0 : i32
    %c0_i32_0 = arith.constant 0 : i32
    %c0_i32_1 = arith.constant 0 : i32
    return %arg0, %c0_i32, %c0_i32_0 : i32, i32, i32
  }
  func.func @transform_12(%arg0: i32) -> (i32, i32, i32) {
    %c0_i32 = arith.constant 0 : i32
    %c0_i32_0 = arith.constant 0 : i32
    %c0_i32_1 = arith.constant 0 : i32
    return %arg0, %c0_i32, %c0_i32_0 : i32, i32, i32
  }
  func.func @transform_13(%arg0: i32) -> (i32, i32, i32) {
    %c0_i32 = arith.constant 0 : i32
    %c0_i32_0 = arith.constant 0 : i32
    %c0_i32_1 = arith.constant 0 : i32
    return %arg0, %c0_i32, %c0_i32_0 : i32, i32, i32
  }
  func.func @transform_14(%arg0: i32) -> (i32, i32, i32, i32) {
    %c0_i32 = arith.constant 0 : i32
    %c0_i32_0 = arith.constant 0 : i32
    %c0_i32_1 = arith.constant 0 : i32
    %c0_i32_2 = arith.constant 0 : i32
    return %arg0, %c0_i32, %c0_i32_0, %c0_i32_1 : i32, i32, i32, i32
  }
  func.func @transform_15(%arg0: i32) -> (i32, i32, i32, i32) {
    %c0_i32 = arith.constant 0 : i32
    %c0_i32_0 = arith.constant 0 : i32
    %c0_i32_1 = arith.constant 0 : i32
    %c0_i32_2 = arith.constant 0 : i32
    return %arg0, %c0_i32, %c0_i32_0, %c0_i32_1 : i32, i32, i32, i32
  }
  func.func @transform_16(%arg0: i32) -> (i32, i32, i32) {
    %c0_i32 = arith.constant 0 : i32
    %c0_i32_0 = arith.constant 0 : i32
    %c0_i32_1 = arith.constant 0 : i32
    return %arg0, %c0_i32, %c0_i32_0 : i32, i32, i32
  }
  func.func @transform_17(%arg0: i32) -> (i32, i32, i32) {
    %c0_i32 = arith.constant 0 : i32
    %c0_i32_0 = arith.constant 0 : i32
    %c0_i32_1 = arith.constant 0 : i32
    return %arg0, %c0_i32, %c0_i32_0 : i32, i32, i32
  }
  func.func @transform_18(%arg0: i32) -> (i32, i32, i32) {
    %c0_i32 = arith.constant 0 : i32
    %c0_i32_0 = arith.constant 0 : i32
    %c0_i32_1 = arith.constant 0 : i32
    return %arg0, %c0_i32, %c0_i32_0 : i32, i32, i32
  }
  func.func @transform_19(%arg0: i32) -> (i32, i32, i32) {
    %c0_i32 = arith.constant 0 : i32
    %c0_i32_0 = arith.constant 0 : i32
    %c0_i32_1 = arith.constant 0 : i32
    return %arg0, %c0_i32, %c0_i32_0 : i32, i32, i32
  }
  func.func @transform_20(%arg0: i32) -> (i32, i32, i32) {
    %c0_i32 = arith.constant 0 : i32
    %c0_i32_0 = arith.constant 0 : i32
    %c0_i32_1 = arith.constant 0 : i32
    %c0_i32_2 = arith.constant 0 : i32
    return %c0_i32, %c0_i32_0, %c0_i32_1 : i32, i32, i32
  }
}

</mosaic_0001>

<bundles_post_ra>
// kernel: tpu_custom_call.1
= control target key start
LH: loop header
LB: loop body
LE: loop exit
PB: predicated region body
PF: predicated region fallthrough
CT: control target
= control target key end

     0   :  { %s4578_s0 = inlined_call_operand.hbm [shape: f32[2,8,32], index: 0, kind: input, shape index: {}]   ;;  %s4579_s1 = inlined_call_operand.hbm [shape: f32[2,8,32], index: 1, kind: input, shape index: {}]   ;;  %s4580_s2 = inlined_call_operand.hbm [shape: f32[8,8], index: 2, kind: input, shape index: {}]   ;;  %s4581_s3 = inlined_call_operand.hbm [shape: f32[8,8], index: 3, kind: input, shape index: {}]   ;;  %s4582_s4 = inlined_call_operand.hbm [shape: bf16[2,32,96], index: 4, kind: input, shape index: {}]   ;;  %s4583_s5 = inlined_call_operand.vmem [shape: f32[2,1,96], index: 5, kind: input, shape index: {}]   ;;  %s4584_s6 = inlined_call_operand.hbm [shape: bf16[2,32,32], index: 6, kind: input, shape index: {}]   ;;  %s4585_s7 = inlined_call_operand.vmem [shape: f32[2,1,32], index: 7, kind: input, shape index: {}]   ;;  %s4586_s8 = inlined_call_operand.hbm [shape: bf16[2,32,32], index: 8, kind: input, shape index: {}]   ;;  %s4587_s9 = inlined_call_operand.vmem [shape: f32[2,1,32], index: 9, kind: input, shape index: {}]   ;;  %s4588_s10 = inlined_call_operand.hbm [shape: bf16[2,32,64], index: 10, kind: input, shape index: {}]   ;;  %s4589_s11 = inlined_call_operand.vmem [shape: f32[2,1,64], index: 11, kind: input, shape index: {}]   ;;  %s4590_s12 = inlined_call_operand.hbm [shape: bf16[2,32,32], index: 12, kind: input, shape index: {}]   ;;  %s4591_s13 = inlined_call_operand.vmem [shape: f32[2,1,32], index: 13, kind: input, shape index: {}]   ;;  %s4592_s14 = inlined_call_operand.vmem [shape: f32[2,3,8,32], index: 14, kind: input, shape index: {}]   ;;  %s4593_s15 = inlined_call_operand.vmem [shape: f32[2,3,8,32], index: 15, kind: input, shape index: {}]   ;;  %s4594_s16 = inlined_call_operand.hbm [shape: bf16[2,32,64], index: 16, kind: input, shape index: {}]   ;;  %s4595_s17 = inlined_call_operand.vmem [shape: f32[2,1,64], index: 17, kind: input, shape index: {}]   ;;  %s4596_s18 = inlined_call_operand.vmem [shape: bf16[2,64,32], index: 18, kind: input, shape index: {}]   ;;  %s4597_s19 = inlined_call_operand.vmem [shape: f32[2,1,32], index: 19, kind: input, shape index: {}]   ;;  %s4598_s20 = inlined_call_operand.hbm [shape: f32[2,8,32], index: 20, kind: output, shape index: {}]  }
   0x1   :  { %4610 = sst [smem:[#allocation26_spill]] %s4578_s0 }
   0x2   :  { %4611 = sst [smem:[#allocation27_spill]] %s4579_s1 }
   0x3   :  { %4612 = sst [smem:[#allocation28_spill]] %s4580_s2 }
   0x4   :  { %4613 = sst [smem:[#allocation29_spill]] %s4581_s3 }
   0x5   :  { %4614 = sst [smem:[#allocation30_spill]] %s4582_s4 }
   0x6   :  { %4615 = sst [smem:[#allocation31_spill]] %s4584_s6 }
   0x7   :  { %4616 = sst [smem:[#allocation32_spill]] %s4585_s7 }
   0x8   :  { %4617 = sst [smem:[#allocation33_spill]] %s4586_s8 }
   0x9   :  { %4618 = sst [smem:[#allocation34_spill]] %s4587_s9 }
   0xa   :  { %4619 = sst [smem:[#allocation35_spill]] %s4589_s11 }
   0xb   :  { %4620 = sst [smem:[#allocation36_spill]] %s4591_s13 }
   0xc   :  { %4621 = sst [smem:[#allocation37_spill]] %s4592_s14 }
   0xd   :  { %4622 = sst [smem:[#allocation38_spill]] %s4593_s15 }
   0xe   :  { %4623 = sst [smem:[#allocation39_spill]] %s4595_s17 }
   0xf   :  { %4624 = sst [smem:[#allocation40_spill]] %s4596_s18 }
  0x10   :  { %4625 = sst [smem:[#allocation41_spill]] %s4597_s19 }
  0x11   :  { %4626 = sst [smem:[#allocation42_spill]] %s4598_s20 }
  0x12   :  { %25 = vsyncpa [#allocation4], 0 }
  0x13   :  { %26 = vsyncpa [#allocation7], 0 }
  0x14   :  { %27 = vsyncpa [#allocation10], 0 }
  0x15   :  { %28 = vsyncpa [#allocation5], 0  ;;  %s3939_s1 = smov 0   ;;  %s3941_s22 = smov 0  }
  0x16   :  { %s3943_s23 = smov 0   ;;  %s3945_s24 = smov 0  }
  0x17 LB: > { %4627 = sst [smem:[#allocation23_spill]] %s3804_s23  ;;  %s3958_s2 = sadd.s32 4294967295, %s3808_s24   ;;  %s3808_s24 = sphi %s3945_s24, %s4669_s24   ;;  %s3804_s23 = sphi %s3943_s23, %s4671_s23   ;;  %s3800_s22 = sphi %s3941_s22, %s4673_s22   ;;  %s3796_s1 = sphi %s3939_s1, %s4672_s1  }
  0x18   : > { %s3961_s25 = sadd.s32 1, %s3808_s24   ;;  %s125_s26 = sadd.s32 1, %s3804_s23 }
  0x19   : > { %4628 = sst [smem:[#allocation24_spill]] %s3961_s25  ;;  %s122_s3 = ssub.s32 %s3808_s24, %s3961_s25 }
  0x1a   : > { %p123_p0 = scmp.eq.s32.totalorder %s122_s3, 0  ;;  %p132_p1 = scmp.ne.s32.totalorder %s3804_s23, %s3800_s22 }
  0x1b   : > { %p133_p2 = scmp.eq.s32.totalorder %s3808_s24, 0  ;;  %p138_p3 = scmp.ne.s32.totalorder %s3800_s22, %s3796_s1 }
  0x1c   : > { %s3971_s27 = scalar_select %p123_p0, %s3804_s23, %s125_s26  }
  0x1d   : > { %p3973_p4 = por %p133_p2, %p132_p1  ;;  %p139_p5 = scmp.eq.s32.totalorder %s3958_s2, 0 }
  0x1e   : > { %4629 = sst [smem:[#allocation25_spill]] %s3971_s27  ;;  %p3010_p6 = scmp.ge.s32.totalorder %s3808_s24, 1 }
  0x1f   : > { %p560_p7 = scmp.lt.s32.totalorder %s3808_s24, 3  ;;  %p3982_p8 = por %p139_p5, %p138_p3 }
  0x20   : > { %p3011_p9 = scmp.ne.s32.totalorder %s3958_s2, 0  ;;  %s4633_s21 = sld [smem:[#allocation26_spill]] }
  0x21   : > { %p3987_p10 = pnand %p3010_p6, %p560_p7  ;;  %s3810_s3 = smov [#allocation3]  }
  0x22   : > { %s573_s26 = sshll.u32 %s3810_s3, 4  ;;  %p3269_p13 = scmp.lt.s32.totalorder %s3808_s24, 2  ;;  %s574_s26 = int_to_ptr.vmem [resolvable:$true] %s573_s26 }
  0x23   : > { %p3233_p11 = pneg %p3987_p10  ;;  %s625_s25 = sand.u32 1, %s3808_s24  }
  0x24   : > { %s4602_s20 = smov 128   ;;  %s4603_s30 = smov 8  }
  0x25   : > { %p3998_p12 = pnand %p3233_p11, %p139_p5  ;;  %s627_s0 = sand.u32 1, %s3804_s23  }
  0x26   : > { %s571_s1 = sshll.u32 %s4633_s21, 4  ;;  %s4010_s21 = sshll.u32 %s627_s0, 4  ;;  %s572_s1 = int_to_ptr.hbm [resolvable:$true] %s571_s1 }
  0x27   : > { %3236 = dma.hbm_to_vmem [thread:$0]  (!%p3998_p12), %s572_s1, 256, %s574_s26, [#allocation4], %s4602_s20, %s4602_s20, %s4603_s30  }
  0x28   : > { %s4013_s3 = sshll.u32 %s3808_s24, 4  ;;  %s4635_s15 = sld [smem:[#allocation30_spill]] }
  0x29   : > { %s629_s13 = scalar_lea.vmem [#allocation11], %s4010_s21  ;;  %p4024_p0 = pnand %p3269_p13, %p3973_p4 }
  0x2a   : > { %s637_s11 = sshll.u32 %s629_s13, 4  ;;  %s4637_s6 = sld [smem:[#allocation31_spill]]  ;;  %s638_s11 = int_to_ptr.vmem [resolvable:$true] %s637_s11 }
  0x2b   : > { %s4032_s30 = scalar_lea.sflag [#allocation4], %s625_s25  ;;  %p4036_p2 = pneg %p4024_p0 }
  0x2e   : > { %s634_s14 = scalar_lea.hbm %s4635_s15, %s4013_s3  ;;  %s3467_s28 = scalar_lea.hbm %s4635_s15, 32 }
  0x2f   : > { %s635_s17 = sshll.u32 %s634_s14, 4  ;;  %s636_s17 = int_to_ptr.hbm [resolvable:$true] %s635_s17 }
  0x30   : > { %s662_s20 = scalar_lea.hbm %s4637_s6, %s4013_s3  ;;  %s3460_s18 = sshra.s32 %s636_s17, 4  ;;  %s3461_s18 = int_to_ptr.hbm [resolvable:$true] %s3460_s18 }
  0x31   : > { %s3462_s14 = scalar_lea.hbm %s3461_s18, 16  ;;  %p3468_p6 = scmp.lt.s32.totalorder %s3461_s18, %s4635_s15 }
  0x32   : > { %p3463_p1 = scmp.ne.s32.totalorder %s3461_s18, %s3462_s14  ;;  %p3469_p7 = scmp.lt.s32.totalorder %s3467_s28, %s3462_s14 }
  0x34   : > { %p3465_p3 = pnand %p4036_p2, %p3463_p1  ;;  %p3470_p11 = por %p3469_p7, %p3468_p6 }
  0x36   : > { %p3466_p4 = pneg %p3465_p3 }
  0x38   : > { %p3471_p13 = pnand %p3470_p11, %p3466_p4 }
  0x3a   : > { %3474 = shalt.err (!%p3471_p13)
}
  0x3b   : > { %s4606_s0 = smov 64   ;;  %s4608_s23 = smov 4  }
  0x3c   : > { %3249 = dma.hbm_to_vmem [thread:$0]  (!%p4024_p0), %s636_s17, 256, %s638_s11, %s4032_s30, %s4606_s0, %s4606_s0, %s4608_s23  }
  0x3d   : > { %s663_s19 = sshll.u32 %s662_s20, 4  ;;  %s657_s24 = scalar_lea.vmem [#allocation12], %s4010_s21  ;;  %s664_s19 = int_to_ptr.hbm [resolvable:$true] %s663_s19 }
  0x3e   : > { %s665_s9 = sshll.u32 %s657_s24, 4  ;;  %s3490_s18 = sshra.s32 %s664_s19, 4  ;;  %s666_s9 = int_to_ptr.vmem [resolvable:$true] %s665_s9  ;;  %s3491_s18 = int_to_ptr.hbm [resolvable:$true] %s3490_s18 }
  0x3f   : > { %s3492_s14 = scalar_lea.hbm %s3491_s18, 16  ;;  %s3497_s25 = scalar_lea.hbm %s4637_s6, 32 }
  0x40   : > { %p3493_p1 = scmp.ne.s32.totalorder %s3491_s18, %s3492_s14  ;;  %p3498_p6 = scmp.lt.s32.totalorder %s3491_s18, %s4637_s6 }
  0x41   : > { %p3499_p7 = scmp.lt.s32.totalorder %s3497_s25, %s3492_s14 }
  0x42   : > { %p3495_p3 = pnand %p3493_p1, %p4036_p2 }
  0x43   : > { %p3500_p11 = por %p3499_p7, %p3498_p6 }
  0x44   : > { %p3496_p4 = pneg %p3495_p3 }
  0x46   : > { %p3501_p13 = pnand %p3500_p11, %p3496_p4 }
  0x48   : > { %3504 = shalt.err (!%p3501_p13)
}
  0x49   : > { %3252 = dma.hbm_to_vmem [thread:$0]  (!%p4024_p0), %s664_s19, 256, %s666_s9, %s4032_s30, %s4606_s0, %s4606_s0, %s4608_s23  }
  0x4a   : > { %s4639_s8 = sld [smem:[#allocation33_spill]]  ;;  %s685_s15 = scalar_lea.vmem [#allocation13], %s4010_s21 }
  0x4b   : > { %s693_s24 = sshll.u32 %s685_s15, 4  ;;  %s694_s24 = int_to_ptr.vmem [resolvable:$true] %s693_s24 }
  0x50   : > { %s690_s20 = scalar_lea.hbm %s4639_s8, %s4013_s3  ;;  %s3527_s9 = scalar_lea.hbm %s4639_s8, 32 }
  0x51   : > { %s691_s7 = sshll.u32 %s690_s20, 4  ;;  %s692_s7 = int_to_ptr.hbm [resolvable:$true] %s691_s7 }
  0x52   : > { %s3520_s18 = sshra.s32 %s692_s7, 4  ;;  %s3521_s18 = int_to_ptr.hbm [resolvable:$true] %s3520_s18 }
  0x53   : > { %s3522_s14 = scalar_lea.hbm %s3521_s18, 16  ;;  %p3528_p6 = scmp.lt.s32.totalorder %s3521_s18, %s4639_s8 }
  0x54   : > { %p3523_p1 = scmp.ne.s32.totalorder %s3521_s18, %s3522_s14  ;;  %p3529_p7 = scmp.lt.s32.totalorder %s3527_s9, %s3522_s14 }
  0x56   : > { %p3525_p3 = pnand %p3523_p1, %p4036_p2  ;;  %p3530_p11 = por %p3529_p7, %p3528_p6 }
  0x58   : > { %p3526_p4 = pneg %p3525_p3 }
  0x5a   : > { %p3531_p13 = pnand %p3530_p11, %p3526_p4 }
  0x5c   : > { %3534 = shalt.err (!%p3531_p13)
}
  0x5d   : > { %3255 = dma.hbm_to_vmem [thread:$0]  (!%p4024_p0), %s692_s7, 256, %s694_s24, %s4032_s30, %s4606_s0, %s4606_s0, %s4608_s23  }
  0x5e   : > { %s718_s20 = scalar_lea.hbm %s4588_s10, %s4013_s3  ;;  %s713_s18 = scalar_lea.vmem [#allocation14], %s4010_s21 }
  0x5f   : > { %s719_s15 = sshll.u32 %s718_s20, 4  ;;  %s721_s14 = sshll.u32 %s713_s18, 4  ;;  %s720_s15 = int_to_ptr.hbm [resolvable:$true] %s719_s15  ;;  %s722_s14 = int_to_ptr.vmem [resolvable:$true] %s721_s14 }
  0x60   : > { %s3550_s28 = sshra.s32 %s720_s15, 4  ;;  %s3557_s7 = scalar_lea.hbm %s4588_s10, 32  ;;  %s3551_s28 = int_to_ptr.hbm [resolvable:$true] %s3550_s28 }
  0x61   : > { %s3552_s26 = scalar_lea.hbm %s3551_s28, 16  ;;  %p3558_p6 = scmp.lt.s32.totalorder %s3551_s28, %s4588_s10 }
  0x62   : > { %p3553_p1 = scmp.ne.s32.totalorder %s3551_s28, %s3552_s26  ;;  %p3559_p7 = scmp.lt.s32.totalorder %s3557_s7, %s3552_s26 }
  0x64   : > { %p3555_p3 = pnand %p3553_p1, %p4036_p2  ;;  %p3560_p11 = por %p3559_p7, %p3558_p6 }
  0x66   : > { %p3556_p4 = pneg %p3555_p3 }
  0x68   : > { %p3561_p13 = pnand %p3560_p11, %p3556_p4 }
  0x6a   : > { %3564 = shalt.err (!%p3561_p13)
}
  0x6b   : > { %3258 = dma.hbm_to_vmem [thread:$0]  (!%p4024_p0), %s720_s15, 256, %s722_s14, %s4032_s30, %s4606_s0, %s4606_s0, %s4608_s23  }
  0x6c   : > { %s4640_s20 = sld [smem:[#allocation27_spill]]  ;;  %s3815_s28 = smov [#allocation6]  }
  0x6d   : > { %s587_s26 = sshll.u32 %s3815_s28, 4  ;;  %s4641_s9 = smov 8   ;;  %s588_s26 = int_to_ptr.vmem [resolvable:$true] %s587_s26 }
  0x6e   : > { %s4642_s19 = smov 128   ;;  %s746_s25 = scalar_lea.hbm %s4590_s12, %s4013_s3 }
  0x6f   : > { %s741_s6 = scalar_lea.vmem [#allocation15], %s4010_s21  ;;  %s747_s14 = sshll.u32 %s746_s25, 4  ;;  %s748_s14 = int_to_ptr.hbm [resolvable:$true] %s747_s14 }
  0x70   : > { %s749_s15 = sshll.u32 %s741_s6, 4  ;;  %s3610_s28 = sshra.s32 %s748_s14, 4  ;;  %s750_s15 = int_to_ptr.vmem [resolvable:$true] %s749_s15  ;;  %s3611_s28 = int_to_ptr.hbm [resolvable:$true] %s3610_s28 }
  0x71   : > { %s3612_s23 = scalar_lea.hbm %s3611_s28, 16  ;;  %p3618_p6 = scmp.lt.s32.totalorder %s3611_s28, %s4590_s12 }
  0x72   : > { %s585_s18 = sshll.u32 %s4640_s20, 4  ;;  %s4643_s20 = sld [smem:[#allocation28_spill]]  ;;  %s586_s18 = int_to_ptr.hbm [resolvable:$true] %s585_s18 }
  0x73   : > { %3239 = dma.hbm_to_vmem [thread:$0]  (!%p3998_p12), %s586_s18, 256, %s588_s26, [#allocation7], %s4642_s19, %s4642_s19, %s4641_s9  }
  0x74   : > { %p3613_p1 = scmp.ne.s32.totalorder %s3611_s28, %s3612_s23  ;;  %s3617_s9 = scalar_lea.hbm %s4590_s12, 32 }
  0x75   : > { %p3619_p7 = scmp.lt.s32.totalorder %s3617_s9, %s3612_s23 }
  0x76   : > { %p3615_p3 = pnand %p3613_p1, %p4036_p2 }
  0x77   : > { %p3620_p11 = por %p3619_p7, %p3618_p6 }
  0x78   : > { %s600_s0 = sshll.u32 %s4643_s20, 4  ;;  %p3616_p4 = pneg %p3615_p3  ;;  %s601_s0 = int_to_ptr.hbm [resolvable:$true] %s600_s0 }
  0x7a   : > { %p3621_p13 = pnand %p3620_p11, %p3616_p4 }
  0x7c   : > { %3624 = shalt.err (!%p3621_p13)
}
  0x7d   : > { %s4644_s7 = smov 4   ;;  %s4645_s24 = smov 64  }
  0x7e   : > { %3261 = dma.hbm_to_vmem [thread:$0]  (!%p4024_p0), %s748_s14, 256, %s750_s15, %s4032_s30, %s4645_s24, %s4645_s24, %s4644_s7  }
  0x7f   : > { %s3816_s25 = smov [#allocation8]   ;;  %s4646_s23 = sld [smem:[#allocation29_spill]] }
  0x80   : > { %s602_s11 = sshll.u32 %s3816_s25, 4  ;;  %s3817_s18 = smov [#allocation9]   ;;  %s603_s11 = int_to_ptr.vmem [resolvable:$true] %s602_s11 }
  0x81   : > { %3242 = dma.hbm_to_vmem [thread:$0]  (!%p3998_p12), %s601_s0, 128, %s603_s11, [#allocation7]  }
  0x82   : > { %s614_s26 = sshll.u32 %s3817_s18, 4  ;;  %s790_s6 = scalar_lea.hbm %s4594_s16, %s4013_s3  ;;  %s615_s26 = int_to_ptr.vmem [resolvable:$true] %s614_s26 }
  0x83   : > { %s791_s15 = sshll.u32 %s790_s6, 4  ;;  %s785_s14 = scalar_lea.vmem [#allocation16], %s4010_s21  ;;  %s792_s15 = int_to_ptr.hbm [resolvable:$true] %s791_s15 }
  0x84   : > { %s793_s25 = sshll.u32 %s785_s14, 4  ;;  %s3700_s17 = sshra.s32 %s792_s15, 4  ;;  %s794_s25 = int_to_ptr.vmem [resolvable:$true] %s793_s25  ;;  %s3701_s17 = int_to_ptr.hbm [resolvable:$true] %s3700_s17 }
  0x85   : > { %s612_s28 = sshll.u32 %s4646_s23, 4  ;;  %s3702_s20 = scalar_lea.hbm %s3701_s17, 16  ;;  %s613_s28 = int_to_ptr.hbm [resolvable:$true] %s612_s28 }
  0x86   : > { %3245 = dma.hbm_to_vmem [thread:$0]  (!%p3998_p12), %s613_s28, 128, %s615_s26, [#allocation10]  }
  0x87   : > { %p3703_p1 = scmp.ne.s32.totalorder %s3701_s17, %s3702_s20  ;;  %s3707_s23 = scalar_lea.hbm %s4594_s16, 32 }
  0x88   : > { %p3708_p6 = scmp.lt.s32.totalorder %s3701_s17, %s4594_s16  ;;  %p3709_p12 = scmp.lt.s32.totalorder %s3707_s23, %s3702_s20 }
  0x89   : > { %p3705_p3 = pnand %p3703_p1, %p4036_p2 }
  0x8a   : > { %p3710_p7 = por %p3709_p12, %p3708_p6 }
  0x8b   : > { %p3706_p4 = pneg %p3705_p3 }
  0x8d   : > { %p3711_p11 = pnand %p3710_p7, %p3706_p4 }
  0x8f   : > { %3714 = shalt.err (!%p3711_p11)
}
  0x90   : > { %3264 = dma.hbm_to_vmem [thread:$0]  (!%p4024_p0), %s792_s15, 256, %s794_s25, %s4032_s30, %s4645_s24, %s4645_s24, %s4644_s7  }
  0x91   : > { %825 = sbr.rel (%p3987_p10) target bundleno = 3491 (0xda3), region = 100 }
  0x96   : > { %3775 = dma.done.wait (%p139_p5), [#allocation4], 256  }
  0x97   : > { %3777 = vsyncadd (%p139_p5), [#allocation4], 4294967040 }
  0x98   : > { %3779 = dma.done.wait (%p139_p5), [#allocation7], 384  }
  0x99   : > { %3781 = vsyncadd (%p139_p5), [#allocation7], 4294966912 }
  0x9a   : > { %3783 = dma.done.wait (%p139_p5), [#allocation10], 128  }
  0x9b   : > { %3785 = vsyncadd (%p139_p5), [#allocation10], 4294967168  ;;  %s847_s27 = sand.u32 1, %s3958_s2   ;;  %s849_s29 = sand.u32 1, %s3800_s22  }
  0x9c   : > { %s4179_s30 = sshll.u32 %s849_s29, 4  ;;  %s848_s21 = scalar_lea.sflag [#allocation4], %s847_s27 }
  0x9d   : > { %s851_s1 = scalar_lea.vmem [#allocation11], %s4179_s30 }
  0x9e   : > { %3787 = dma.done.wait (%p3982_p8), %s848_s21, 1536  }
  0x9f   : > { %3789 = vsyncadd (%p3982_p8), %s848_s21, 4294965760  ;;  %p1015_p5 = scmp.lt.s32.totalorder %s3958_s2, 1  ;;  %s4649_s0 = sld [smem:[#allocation35_spill]] }
  0xa0   : > { %s4652_s19 = sld [smem:[#allocation37_spill]]  ;;  %s861_s24 = scalar_lea.vmem [#allocation12], %s4179_s30 }
  0xa1   : > { %s4188_s13 = scalar_select %p1015_p5, %s3958_s2, 1 }
  0xa2   : > { %s4653_s14 = sld [smem:[#allocation38_spill]]  ;;  %s871_s4 = scalar_lea.vmem [#allocation13], %s4179_s30 }
  0xa3   : > { %s3200_s29 = smul.u32 24, %s4188_s13  ;;  %s3126_s28 = sshll.u32 %s4188_s13, 5 }
  0xa4   : > { %s4654_s23 = sld [smem:[#allocation40_spill]]  ;;  %s881_s25 = scalar_lea.vmem [#allocation14], %s4179_s30 }
  0xa5   : > { %s1026_s11 = scalar_lea.vmem %s4649_s0, %s4188_s13  ;;  %s891_s26 = scalar_lea.vmem [#allocation15], %s4179_s30 }
  0xa6   : > { %s4219_s8 = scalar_lea.vmem %s4652_s19, %s3200_s29  ;;  %s901_s19 = scalar_lea.vmem [#allocation16], %s4179_s30 }
  0xa7   : > { %1054 = sbr.rel (%p3011_p9) target bundleno = 175 (0xaf), region = 144 }
  0xa8   : > { %s4224_s17 = scalar_lea.vmem %s4653_s14, %s3200_s29 }
  0xaa   : > { %s4229_s3 = scalar_lea.vmem %s4654_s23, %s3126_s28 }
  0xac   : > { %v1055_v0 = vld [vmem:[#allocation3] sm:$0xff]  ;;  %vm1057_vm0 = vcmask 261120   ;;  %v1056_v1 = vld [vmem:[#allocation3 + $0x8] sm:$0xff] }
  0xad   : > { %1058 = vst.msk [vmem:[#allocation17] sm:$0xff] %vm1057_vm0, %v1055_v0 }
  0xae   : > { %1059 = vst.msk [vmem:[#allocation17 + $0x8] sm:$0xff] %vm1057_vm0, %v1056_v1 }
  0xaf PF: > { %v3191_v2 = vld [vmem:[%s851_s1 + $0x8] sm:$0xff]   ;;  %v3128_v3 = vld [vmem:[%s851_s1] sm:$0xff]   ;;  %vm1078_vm1 = vcmask 261120   ;;  %s4656_s29 = scalar_lea.vmem %s4583_s5, %s4188_s13  ;;  %s3818_s28 = smov 88   ;;  %vm1113_vm2 = vcmask 64512   ;;  %vm1381_vm3 = vcmask 130112  }
  0xb0   : > { %v3134_v4 = vunpack.c.h.bf16 %v3191_v2  ;;  %v3133_v5 = vunpack.c.l.bf16 %v3191_v2  ;;  %v3130_v6 = vunpack.c.h.bf16 %v3128_v3  ;;  %v3129_v7 = vunpack.c.l.bf16 %v3128_v3  ;;  %v3347_v10 = vld [vmem:[%s4656_s29] ss:$0 sm:$0xff]  ;;  %s3819_s9 = smov 96   ;;  %s3820_s6 = smov 80   ;;  %v1064_v35 = vld [vmem:[#allocation8] sm:$0xff] }
  0xb1   : > { %s3821_s15 = smov 120   ;;  %s3822_s14 = smov 72   ;;  %vm1522_vm4 = vcmask 195712   ;;  %vm1663_vm5 = vcmask 261312  }
  0xb2   : > { %1097 = vmatpush.msra.mxu0 %v3134_v4  ;;  %s3823_s20 = smov 112   ;;  %s3824_s0 = smov 104  }
  0xb3   : > { %s3825_s23 = smov 64   ;;  %s3826_s18 = smov 48  }
  0xb4   : > { %1098 = vmatpush.msra.mxu0 %v3133_v5  ;;  %v4242_v8 = vld [vmem:[#allocation17] sm:$0xff]  ;;  %s3827_s21 = smov 56   ;;  %s3828_s1 = smov 40  }
  0xb5   : > { %v4246_v9 = vld [vmem:[#allocation17 + $0x8] sm:$0xff]  ;;  %s3829_s27 = smov 8   ;;  %s3830_s29 = smov 16  }
  0xb6   : > { %1099 = vmatpush.msra.mxu0 %v3130_v6  ;;  %p3274_p8 = scmp.eq.s32.totalorder %s3958_s2, 1 }
  0xb8   : > { %1100 = vmatpush.msra.mxu0 %v3129_v7 }
  0xb9   : > { %3050 = vmatmul.msk.f32.vlgmr.msra.gmra.mxu0 %vm1078_vm1, %v4242_v8 }
  0xc1   : > { %3051 = vmatmul.msk.f32.gmra.mxu0 %vm1078_vm1, %v4246_v9 }
 0x136   : > { %v1102_v11 = vpop.f32.mrf.mxu0 }
 0x137   : > { %v4255_v12 = vadd.f32 %v3347_v10, %v1102_v11 }
 0x139   : > { %1245 = vrot.lane.b32.xlu2 %v4255_v12, %s3818_s28  ;;  %1111 = vrot.lane.b32.xlu0 %v4255_v12, %s3819_s9  ;;  %v1108_v16 = vmul.f32 0.35355338, %v4255_v12 }
 0x13e   : > { %v1105_v13 = vpop.f32.mrf.mxu0 }
 0x13f   : > { %v4261_v14 = vadd.f32 %v3347_v10, %v1105_v13 }
 0x141   : > { %1273 = vrot.lane.b32.xlu1 %v4261_v14, %s3818_s28  ;;  %1386 = vrot.lane.b32.xlu2 %v4255_v12, %s3820_s6  ;;  %v1109_v15 = vmul.f32 0.35355338, %v4261_v14  ;;  %v3332_v17 = vpack.i.bf16 %v4261_v14, %v4255_v12 }
 0x142   : > { %1140 = vrot.lane.b32.xlu0 %v4261_v14, %s3819_s9 }
 0x149   : > { %1271 = vrot.lane.b32.xlu1 %v1109_v15, %s3821_s15  ;;  %1527 = vrot.lane.b32.xlu2 %v4255_v12, %s3822_s14 }
 0x14a   : > { %1243 = vrot.lane.b32.xlu0 %v1108_v16, %s3821_s15 }
 0x151   : > { %1412 = vrot.lane.b32.xlu2 %v1109_v15, %s3823_s20  ;;  %1384 = vrot.lane.b32.xlu1 %v1108_v16, %s3823_s20 }
 0x152   : > { %1525 = vrot.lane.b32.xlu0 %v1108_v16, %s3824_s0 }
 0x159   : > { %3333 = vrot.lane.b32.xlu2 %v3332_v17, %s3825_s23  ;;  %1414 = vrot.lane.b32.xlu1 %v4261_v14, %s3820_s6  ;;  %s3831_s23 = smov 24  }
 0x15a   : > { %1555 = vrot.lane.b32.xlu0 %v4261_v14, %s3822_s14 }
 0x161   : > { %1553 = vrot.lane.b32.xlu1 %v1109_v15, %s3824_s0 }
 0x193   : > { %v1246_v18 = vpop.permute.xlu2 %1245 }
 0x19b   : > { %v1387_v19 = vpop.permute.xlu2 %1386 }
 0x1a3   : > { %v1528_v20 = vpop.permute.xlu2 %1527 }
 0x1ab   : > { %v1413_v21 = vpop.permute.xlu2 %1412  ;;  %v1112_v22 = vpop.permute.xlu0 %1111 }
 0x1ac   : > { %3052 = vmatpush.xpose.msk.msra.mxu1 %vm1113_vm2, %v1112_v22 }
 0x1af   : > { %3053 = vmatmul.msk.f32.vlgmr.msra.gmra.mxu1 %vm1113_vm2, %v1108_v16 }
 0x1b0   : > { %3058 = vmatpush.xpose.msk.msrb.mxu1 %vm1113_vm2, %v1246_v18 }
 0x1b3   : > { %v1274_v23 = vpop.permute.xlu1 %1273  ;;  %v3334_v24 = vpop.permute.xlu2 %3333 }
 0x1b4   : > { %v1141_v25 = vpop.permute.xlu0 %1140  ;;  %3060 = vmatpush.xpose.msk.msra.mxu2 %vm1113_vm2, %v1274_v23  ;;  %v3335_v26 = vunpack.i.l.bf16 %v3334_v24  ;;  %v3336_v27 = vunpack.i.h.bf16 %v3334_v24 }
 0x1b5   : > { %3054 = vmatpush.xpose.msk.msrb.mxu0 %vm1113_vm2, %v1141_v25 }
 0x1b6   : > { %1210 = vmatpush.msra.mxu3 %v3335_v26 }
 0x1b8   : > { %3064 = vmatpush.xpose.msk.msrb.mxu2 %vm1113_vm2, %v1387_v19  ;;  %1236 = vmatpush.msrb.mxu3 %v3336_v27 }
 0x1b9   : > { %3055 = vmatmul.msk.f32.vlgmr.msrb.gmra.mxu0 %vm1113_vm2, %v1109_v15 }
 0x1bb   : > { %v1272_v28 = vpop.permute.xlu1 %1271 }
 0x1bc   : > { %v1244_v29 = vpop.permute.xlu0 %1243  ;;  %3061 = vmatmul.msk.f32.vlgmr.msra.gmra.mxu2 %vm1113_vm2, %v1272_v28 }
 0x1bd   : > { %3059 = vmatmul.msk.f32.vlgmr.msrb.gmra.mxu1 %vm1113_vm2, %v1244_v29  ;;  %3070 = vmatpush.xpose.msk.msra.mxu2 %vm1113_vm2, %v1528_v20 }
 0x1c3   : > { %v1385_v30 = vpop.permute.xlu1 %1384 }
 0x1c4   : > { %v1526_v31 = vpop.permute.xlu0 %1525  ;;  %3065 = vmatmul.msk.f32.vlgmr.msrb.gmra.mxu2 %vm1113_vm2, %v1385_v30 }
 0x1cb   : > { %v1415_v32 = vpop.permute.xlu1 %1414 }
 0x1cc   : > { %v1556_v33 = vpop.permute.xlu0 %1555  ;;  %3066 = vmatpush.xpose.msk.msra.mxu0 %vm1113_vm2, %v1415_v32  ;;  %3071 = vmatmul.msk.f32.vlgmr.msra.gmra.mxu2 %vm1113_vm2, %v1526_v31 }
 0x1cf   : > { %3067 = vmatmul.msk.f32.vlgmr.msra.gmra.mxu0 %vm1113_vm2, %v1413_v21 }
 0x1d0   : > { %3072 = vmatpush.xpose.msk.msrb.mxu0 %vm1113_vm2, %v1556_v33 }
 0x1d3   : > { %v1554_v34 = vpop.permute.xlu1 %1553 }
 0x1d7   : > { %3073 = vmatmul.msk.f32.vlgmr.msrb.gmra.mxu0 %vm1113_vm2, %v1554_v34 }
 0x22c   : > { %v1136_v36 = vpop.f32.mrf.mxu1 }
 0x22d   : > { %v1137_v37 = vadd.f32 %v1136_v36, %v1064_v35 }
 0x22f   : > { %v1167_v38 = vsel %vm1113_vm2, %v1137_v37, -inf }
 0x230   : > { %1168 = vmax.xlane.f32.xlu2 %v1167_v38 }
 0x236   : > { %v1164_v39 = vpop.f32.mrf.mxu0 }
 0x237   : > { %v1165_v40 = vadd.f32 %v1164_v39, %v1064_v35 }
 0x239   : > { %v1170_v41 = vsel %vm1113_vm2, %v1165_v40, -inf }
 0x23a   : > { %1171 = vmax.xlane.f32.xlu0 %v1170_v41  ;;  %v1268_v42 = vpop.f32.mrf.mxu1 }
 0x23b   : > { %v1269_v43 = vadd.f32 %v1268_v42, %v1064_v35 }
 0x23d   : > { %v1299_v44 = vsel %vm1113_vm2, %v1269_v43, -inf }
 0x23e   : > { %1300 = vmax.xlane.f32.xlu1 %v1299_v44 }
 0x23f   : > { %v1296_v45 = vpop.f32.mrf.mxu2 }
 0x240   : > { %v1297_v46 = vadd.f32 %v1296_v45, %v1064_v35 }
 0x242   : > { %v1302_v47 = vsel %vm1113_vm2, %v1297_v46, -inf }
 0x243   : > { %1303 = vmax.xlane.f32.xlu0 %v1302_v47 }
 0x247   : > { %v1409_v48 = vpop.f32.mrf.mxu2 }
 0x248   : > { %v1410_v49 = vadd.f32 %v1409_v48, %v1064_v35 }
 0x24a   : > { %v1440_v50 = vsel %vm1113_vm2, %v1410_v49, -inf }
 0x24b   : > { %1441 = vmax.xlane.f32.xlu2 %v1440_v50 }
 0x24c   : > { %v1437_v54 = vpop.f32.mrf.mxu0 }
 0x24d   : > { %v1438_v56 = vadd.f32 %v1437_v54, %v1064_v35 }
 0x24f   : > { %v1550_v51 = vpop.f32.mrf.mxu2  ;;  %v1443_v58 = vsel %vm1113_vm2, %v1438_v56, -inf }
 0x250   : > { %v1551_v52 = vadd.f32 %v1550_v51, %v1064_v35 }
 0x252   : > { %v1581_v53 = vsel %vm1113_vm2, %v1551_v52, -inf }
 0x253   : > { %1582 = vmax.xlane.f32.xlu2 %v1581_v53 }
 0x254   : > { %v1578_v55 = vpop.f32.mrf.mxu0 }
 0x255   : > { %v1579_v57 = vadd.f32 %v1578_v55, %v1064_v35 }
 0x257   : > { %1462 = vrot.lane.b32.xlu1 %v4255_v12, %s3826_s18  ;;  %1321 = vrot.lane.b32.xlu0 %v4255_v12, %s3827_s21  ;;  %v1584_v59 = vsel %vm1113_vm2, %v1579_v57, -inf }
 0x281   : > { %1444 = vmax.xlane.f32.xlu1 %v1443_v58  ;;  %1585 = vmax.xlane.f32.xlu0 %v1584_v59 }
 0x2a3   : > { %v1169_v60 = vpop.xlane.xlu2 %1168 }
 0x2a4   : > { %v1173_v61 = vsub.f32 %v1137_v37, %v1169_v60 }
 0x2a6   : > { %v1175_v62 = vmul.f32 1.442695, %v1173_v61 }
 0x2a8   : > { %3354 = vpow2.f32 %v1175_v62 }
 0x2ad   : > { %v1172_v63 = vpop.xlane.xlu0 %1171 }
 0x2ae   : > { %v1174_v0 = vsub.f32 %v1165_v40, %v1172_v63  ;;  %v3355_v1 = vpop.eup %3354 }
 0x2af   : > { %v1179_v3 = vsel %vm1113_vm2, %v3355_v1, 0.0 }
 0x2b0   : > { %v1177_v2 = vmul.f32 1.442695, %v1174_v0  ;;  %1180 = vadd.xlane.f32.xlu2 %v1179_v3 }
 0x2b1   : > { %v1301_v4 = vpop.xlane.xlu1 %1300 }
 0x2b2   : > { %3356 = vpow2.f32 %v1177_v2  ;;  %v1305_v5 = vsub.f32 %v1269_v43, %v1301_v4 }
 0x2b4   : > { %v1307_v6 = vmul.f32 1.442695, %v1305_v5 }
 0x2b6   : > { %3358 = vpow2.f32 %v1307_v6  ;;  %v1304_v7 = vpop.xlane.xlu0 %1303 }
 0x2b7   : > { %v1306_v11 = vsub.f32 %v1297_v46, %v1304_v7 }
 0x2b8   : > { %v3357_v10 = vpop.eup %3356 }
 0x2b9   : > { %v1182_v13 = vsel %vm1113_vm2, %v3357_v10, 0.0  ;;  %v1309_v15 = vmul.f32 1.442695, %v1306_v11 }
 0x2ba   : > { %1183 = vadd.xlane.f32.xlu1 %v1182_v13 }
 0x2bb   : > { %3360 = vpow2.f32 %v1309_v15 }
 0x2bc   : > { %v3359_v16 = vpop.eup %3358 }
 0x2bd   : > { %v1311_v17 = vsel %vm1113_vm2, %v3359_v16, 0.0 }
 0x2be   : > { %1312 = vadd.xlane.f32.xlu0 %v1311_v17  ;;  %v1442_v18 = vpop.xlane.xlu2 %1441  ;;  %v3136_v17 = vld [vmem:[%s861_s24] sm:$0xff]  }
 0x2bf   : > { %v1446_v19 = vsub.f32 %v1410_v49, %v1442_v18 }
 0x2c1   : > { %v1448_v20 = vmul.f32 1.442695, %v1446_v19  ;;  %v4316_v21 = vpop.eup %3360 }
 0x2c2   : > { %v1314_v22 = vsel %vm1113_vm2, %v4316_v21, 0.0 }
 0x2c3   : > { %3362 = vpow2.f32 %v1448_v20  ;;  %v3138_v20 = vunpack.c.h.bf16 %v3136_v17 }
 0x2c6   : > { %1315 = vadd.xlane.f32.xlu0 %v1314_v22  ;;  %v1583_v23 = vpop.xlane.xlu2 %1582 }
 0x2c7   : > { %v1587_v24 = vsub.f32 %v1551_v52, %v1583_v23 }
 0x2c8   : > { %1603 = vrot.lane.b32.xlu2 %v4255_v12, %s3828_s1 }
 0x2c9   : > { %v3363_v25 = vpop.eup %3362  ;;  %v1589_v26 = vmul.f32 1.442695, %v1587_v24  ;;  %v1463_v30 = vpop.permute.xlu1 %1462 }
 0x2ca   : > { %v1452_v27 = vsel %vm1113_vm2, %v3363_v25, 0.0  ;;  %v1322_v33 = vpop.permute.xlu0 %1321 }
 0x2cb   : > { %3364 = vpow2.f32 %v1589_v26  ;;  %1453 = vadd.xlane.f32.xlu1 %v1452_v27 }
 0x2d1   : > { %v3365_v28 = vpop.eup %3364 }
 0x2d2   : > { %v1593_v29 = vsel %vm1113_vm2, %v3365_v28, 0.0 }
 0x2d3   : > { %1594 = vadd.xlane.f32.xlu1 %v1593_v29 }
 0x2da   : > { %1488 = vrot.lane.b32.xlu0 %v4261_v14, %s3826_s18 }
 0x2ec   : > { %1347 = vrot.lane.b32.xlu1 %v4261_v14, %s3827_s21  ;;  %s4657_s21 = sld [smem:[#allocation32_spill]] }
 0x2f4   : > { %v1445_v31 = vpop.xlane.xlu1 %1444  ;;  %v1586_v36 = vpop.xlane.xlu0 %1585 }
 0x2f5   : > { %v1447_v32 = vsub.f32 %v1438_v56, %v1445_v31  ;;  %v1588_v37 = vsub.f32 %v1579_v57, %v1586_v36 }
 0x2f7   : > { %v1450_v12 = vmul.f32 1.442695, %v1447_v32  ;;  %v1591_v38 = vmul.f32 1.442695, %v1588_v37 }
 0x2f9   : > { %3366 = vpow2.f32 %v1450_v12 }
 0x2fa   : > { %3368 = vpow2.f32 %v1591_v38 }
 0x2ff   : > { %v3367_v34 = vpop.eup %3366 }
 0x300   : > { %v1455_v35 = vsel %vm1113_vm2, %v3367_v34, 0.0  ;;  %v3369_v39 = vpop.eup %3368 }
 0x301   : > { %1456 = vadd.xlane.f32.xlu2 %v1455_v35  ;;  %v1596_v40 = vsel %vm1113_vm2, %v3369_v39, 0.0 }
 0x316   : > { %1597 = vadd.xlane.f32.xlu1 %v1596_v40 }
 0x319   : > { %1629 = vrot.lane.b32.xlu2 %v4261_v14, %s3828_s1  ;;  %s4658_s1 = scalar_lea.vmem %s4657_s21, %s4188_s13 }
 0x323   : > { %v1181_v41 = vpop.xlane.xlu2 %1180 }
 0x324   : > { %3370 = vrcp.f32 %v1181_v41 }
 0x32a   : > { %v3371_v42 = vpop.eup %3370 }
 0x32b   : > { %v1187_v43 = vmul.f32 %v3371_v42, %v3355_v1  ;;  %v1604_v50 = vpop.permute.xlu2 %1603 }
 0x32d   : > { %v1184_v44 = vpop.xlane.xlu1 %1183  ;;  %3056 = vmatmul.msk.f32.vlgmr.msra.gmra.mxu3 %vm1113_vm2, %v1187_v43 }
 0x32e   : > { %3372 = vrcp.f32 %v1184_v44  ;;  %1342 = vmatpush.msra.mxu3 %v1322_v33 }
 0x331   : > { %v1313_v45 = vpop.xlane.xlu0 %1312 }
 0x332   : > { %3374 = vrcp.f32 %v1313_v45 }
 0x334   : > { %v3373_v46 = vpop.eup %3372 }
 0x335   : > { %v1188_v47 = vmul.f32 %v3373_v46, %v3357_v10 }
 0x337   : > { %3057 = vmatmul.msk.f32.vlgmr.msrb.gmra.mxu3 %vm1113_vm2, %v1188_v47 }
 0x338   : > { %1483 = vmatpush.msrb.mxu3 %v1463_v30  ;;  %v3375_v48 = vpop.eup %3374  ;;  %v3348_v30 = vld [vmem:[%s4658_s1] ss:$0 sm:$0xff]  ;;  %s4660_s1 = sld [smem:[#allocation34_spill]] }
 0x339   : > { %v1319_v49 = vmul.f32 %v3375_v48, %v3359_v16  ;;  %v1316_v56 = vpop.xlane.xlu0 %1315  ;;  %v3192_v16 = vld [vmem:[%s861_s24 + $0x8] sm:$0xff]  }
 0x33a   : > { %v3142_v18 = vunpack.c.h.bf16 %v3192_v16  ;;  %v3141_v19 = vunpack.c.l.bf16 %v3192_v16 }
 0x33c   : > { %1698 = vmatpush.msrb.mxu2 %v3142_v18 }
 0x33e   : > { %v1454_v14 = vpop.xlane.xlu1 %1453  ;;  %1699 = vmatpush.msrb.mxu2 %v3141_v19  ;;  %s4661_s7 = scalar_lea.vmem %s4660_s1, %s4188_s13 }
 0x33f   : > { %3062 = vmatmul.msk.f32.vlgmr.msra.gmra.mxu3 %vm1113_vm2, %v1319_v49  ;;  %3376 = vrcp.f32 %v1454_v14 }
 0x340   : > { %1624 = vmatpush.msra.mxu3 %v1604_v50  ;;  %1700 = vmatpush.msrb.mxu2 %v3138_v20 }
 0x345   : > { %v3377_v51 = vpop.eup %3376 }
 0x346   : > { %v1460_v52 = vmul.f32 %v3377_v51, %v3363_v25  ;;  %v1595_v53 = vpop.xlane.xlu1 %1594 }
 0x347   : > { %3378 = vrcp.f32 %v1595_v53 }
 0x348   : > { %3068 = vmatmul.msk.f32.vlgmr.msrb.gmra.mxu3 %vm1113_vm2, %v1460_v52  ;;  %3380 = vrcp.f32 %v1316_v56 }
 0x34c   : > { %v1489_v60 = vpop.permute.xlu0 %1488 }
 0x34d   : > { %v3379_v54 = vpop.eup %3378 }
 0x34e   : > { %v1601_v55 = vmul.f32 %v3379_v54, %v3365_v28  ;;  %v3381_v57 = vpop.eup %3380 }
 0x34f   : > { %v1320_v58 = vmul.f32 %v3381_v57, %v4316_v21  ;;  %v3137_v21 = vunpack.c.l.bf16 %v3136_v17  ;;  %v3194_v57 = vld [vmem:[%s881_s25 + $0x8] sm:$0xff]  }
 0x350   : > { %3074 = vmatmul.msk.f32.vlgmr.msra.gmra.mxu3 %vm1113_vm2, %v1601_v55 }
 0x351   : > { %1701 = vmatpush.msrb.mxu2 %v3137_v21 }
 0x35e   : > { %v1348_v59 = vpop.permute.xlu1 %1347 }
 0x35f   : > { %1368 = vmatpush.msra.mxu1 %v1348_v59  ;;  %v3157_v59 = vunpack.c.l.bf16 %v3194_v57 }
 0x360   : > { %3063 = vmatmul.msk.f32.vlgmr.msra.gmra.mxu1 %vm1113_vm2, %v1320_v58  ;;  %v3158_v58 = vunpack.c.h.bf16 %v3194_v57 }
 0x361   : > { %1509 = vmatpush.msrb.mxu1 %v1489_v60  ;;  %v3152_v60 = vld [vmem:[%s881_s25] sm:$0xff]  }
 0x362   : > { %1858 = vmatpush.msrb.mxu3 %v3158_v58 }
 0x364   : > { %1859 = vmatpush.msrb.mxu3 %v3157_v59 }
 0x374   : > { %v1457_v61 = vpop.xlane.xlu2 %1456 }
 0x375   : > { %3382 = vrcp.f32 %v1457_v61  ;;  %v3154_v61 = vunpack.c.h.bf16 %v3152_v60 }
 0x377   : > { %1860 = vmatpush.msrb.mxu3 %v3154_v61 }
 0x37b   : > { %v3383_v62 = vpop.eup %3382 }
 0x37c   : > { %v1461_v63 = vmul.f32 %v3383_v62, %v3367_v34  ;;  %v1630_v0 = vpop.permute.xlu2 %1629  ;;  %v3153_v62 = vunpack.c.l.bf16 %v3152_v60 }
 0x37d   : > { %1650 = vmatpush.msra.mxu1 %v1630_v0 }
 0x37e   : > { %3069 = vmatmul.msk.f32.vlgmr.msrb.gmra.mxu1 %vm1113_vm2, %v1461_v63  ;;  %1861 = vmatpush.msrb.mxu3 %v3153_v62  ;;  %v1062_v63 = vld [vmem:[#allocation6] sm:$0xff] }
 0x37f   : > { %3080 = vmatmul.msk.f32.vlgmr.msrb.gmra.mxu3 %vm1078_vm1, %v1062_v63 }
 0x389   : > { %v1598_v1 = vpop.xlane.xlu1 %1597 }
 0x38a   : > { %3384 = vrcp.f32 %v1598_v1 }
 0x390   : > { %v3385_v2 = vpop.eup %3384 }
 0x391   : > { %v1602_v3 = vmul.f32 %v3385_v2, %v3369_v39  ;;  %v3193_v2 = vld [vmem:[%s871_s4 + $0x8] sm:$0xff]  }
 0x393   : > { %3075 = vmatmul.msk.f32.vlgmr.msra.gmra.mxu1 %vm1113_vm2, %v1602_v3  ;;  %v3150_v3 = vunpack.c.h.bf16 %v3193_v2 }
 0x395   : > { %1815 = vmatpush.msra.mxu0 %v3150_v3 }
 0x3b0   : > { %v1212_v4 = vpop.f32.mrf.mxu3 }
 0x3b1   : > { %1241 = vst.msk [vmem:[#allocation2] sm:$0xff] %vm1113_vm2, %v1212_v4 }
 0x3ba   : > { %v1238_v5 = vpop.f32.mrf.mxu3 }
 0x3bb   : > { %1242 = vst.msk [vmem:[#allocation2 + $0x8] sm:$0xff] %vm1113_vm2, %v1238_v5  ;;  %v3149_v5 = vunpack.c.l.bf16 %v3193_v2  ;;  %v1065_v2 = vld [vmem:[#allocation9] sm:$0xff] }
 0x3bd   : > { %1816 = vmatpush.msra.mxu0 %v3149_v5 }
 0x3c2   : > { %v1344_v6 = vpop.f32.mrf.mxu3 }
 0x3c3   : > { %1375 = vrot.lane.b32.xlu0 %v1344_v6, %s3829_s27  ;;  %v3144_v6 = vld [vmem:[%s871_s4] sm:$0xff]   ;;  %s3833_s4 = smov 128  }
 0x3cb   : > { %v1485_v7 = vpop.f32.mrf.mxu3 }
 0x3cc   : > { %1516 = vrot.lane.b32.xlu1 %v1485_v7, %s3830_s29  ;;  %v3146_v7 = vunpack.c.h.bf16 %v3144_v6 }
 0x3ce   : > { %1817 = vmatpush.msra.mxu0 %v3146_v7 }
 0x3d3   : > { %v1626_v10 = vpop.f32.mrf.mxu3 }
 0x3d4   : > { %1657 = vrot.lane.b32.xlu2 %v1626_v10, %s3831_s23 }
 0x3dd   : > { %v1370_v11 = vpop.f32.mrf.mxu1 }
 0x3de   : > { %1377 = vrot.lane.b32.xlu0 %v1370_v11, %s3829_s27  ;;  %v3145_v11 = vunpack.c.l.bf16 %v3144_v6 }
 0x3e0   : > { %1818 = vmatpush.msra.mxu0 %v3145_v11 }
 0x3fb   : > { %v1511_v13 = vpop.f32.mrf.mxu1 }
 0x3fc   : > { %1518 = vrot.lane.b32.xlu2 %v1511_v13, %s3830_s29 }
 0x410   : > { %v1652_v15 = vpop.f32.mrf.mxu1 }
 0x411   : > { %1659 = vrot.lane.b32.xlu0 %v1652_v15, %s3831_s23 }
 0x42e   : > { %v1658_v24 = vpop.permute.xlu2 %1657 }
 0x435   : > { %v1376_v22 = vpop.permute.xlu0 %1375 }
 0x436   : > { %1382 = vst.msk [vmem:[#allocation2] sm:$0xff] %vm1381_vm3, %v1376_v22 }
 0x43e   : > { %v1517_v23 = vpop.permute.xlu1 %1516 }
 0x43f   : > { %1523 = vst.msk [vmem:[#allocation2] sm:$0xff] %vm1522_vm4, %v1517_v23 }
 0x440   : > { %1664 = vst.msk [vmem:[#allocation2] sm:$0xff] %vm1663_vm5, %v1658_v24 }
 0x447   : > { %v1666_v25 = vld [vmem:[#allocation2] sm:$0xff] }
 0x448   : > { %3076 = vmatmul.msk.f32.vlgmr.msrb.gmra.mxu2 %vm1078_vm1, %v1666_v25 }
 0x450   : > { %v1378_v26 = vpop.permute.xlu0 %1377 }
 0x451   : > { %1383 = vst.msk [vmem:[#allocation2 + $0x8] sm:$0xff] %vm1381_vm3, %v1378_v26  ;;  %v1711_v26 = vld [vmem:[%s4219_s8] sm:$0xff] }
 0x456   : > { %v1519_v27 = vpop.permute.xlu2 %1518 }
 0x457   : > { %1524 = vst.msk [vmem:[#allocation2 + $0x8] sm:$0xff] %vm1522_vm4, %v1519_v27 }
 0x483   : > { %v1660_v28 = vpop.permute.xlu0 %1659 }
 0x484   : > { %1665 = vst.msk [vmem:[#allocation2 + $0x8] sm:$0xff] %vm1663_vm5, %v1660_v28  ;;  %v1712_v28 = vld [vmem:[%s4224_s17] sm:$0xff] }
 0x48b   : > { %v1667_v29 = vld [vmem:[#allocation2 + $0x8] sm:$0xff] }
 0x48c   : > { %3077 = vmatmul.msk.f32.gmra.mxu2 %vm1078_vm1, %v1667_v29 }
 0x4cb   : > { %v1703_v31 = vpop.f32.mrf.mxu2 }
 0x4cc   : > { %v1704_v32 = vadd.f32 %v3348_v30, %v1703_v31  ;;  %v1063_v31 = vld [vmem:[#allocation6 + $0x8] sm:$0xff] }
 0x4cd   : > { %3081 = vmatmul.msk.f32.gmra.mxu3 %vm1078_vm1, %v1063_v31 }
 0x4ce   : > { %v1709_v12 = vadd.f32 %v1704_v32, %v4242_v8 }
 0x4d0   : > { %v1713_v33 = vsel %vm1078_vm1, %v1709_v12, 0.0 }
 0x4d1   : > { %1714 = vadd.xlane.f32.xlu2 %v1713_v33 }
 0x50f   : > { %v1706_v34 = vpop.f32.mrf.mxu2 }
 0x510   : > { %v1707_v35 = vadd.f32 %v3348_v30, %v1706_v34 }
 0x512   : > { %v1710_v36 = vadd.f32 %v1707_v35, %v4246_v9 }
 0x514   : > { %v1716_v37 = vsel %vm1078_vm1, %v1710_v36, 0.0 }
 0x515   : > { %1717 = vadd.xlane.f32.xlu0 %v1716_v37 }
 0x544   : > { %v1715_v38 = vpop.xlane.xlu2 %1714 }
 0x545   : > { %v1719_v39 = vrot.slane %v1715_v38, 4 }
 0x547   : > { %v1720_v40 = vadd.f32 %v1719_v39, %v1715_v38 }
 0x549   : > { %v1721_v41 = vrot.slane %v1720_v40, 2 }
 0x54b   : > { %v1722_v42 = vadd.f32 %v1721_v41, %v1720_v40 }
 0x54d   : > { %v1723_v43 = vrot.slane %v1722_v42, 1 }
 0x54f   : > { %v1724_v44 = vadd.f32 %v1723_v43, %v1722_v42 }
 0x551   : > { %v1731_v45 = vmul.f32 0.00390625, %v1724_v44 }
 0x553   : > { %v1733_v46 = vsub.f32 %v1709_v12, %v1731_v45 }
 0x555   : > { %v1735_v8 = vmul.f32 %v1733_v46, %v1733_v46 }
 0x557   : > { %v1737_v47 = vsel %vm1078_vm1, %v1735_v8, 0.0 }
 0x558   : > { %1738 = vadd.xlane.f32.xlu1 %v1737_v47 }
 0x588   : > { %v1718_v48 = vpop.xlane.xlu0 %1717 }
 0x589   : > { %v1725_v9 = vrot.slane %v1718_v48, 4 }
 0x58b   : > { %v1726_v49 = vadd.f32 %v1725_v9, %v1718_v48  ;;  %v3349_v9 = vld [vmem:[%s1026_s11] ss:$0 sm:$0xff] }
 0x58d   : > { %v1727_v50 = vrot.slane %v1726_v49, 2 }
 0x58f   : > { %v1728_v14 = vadd.f32 %v1727_v50, %v1726_v49  ;;  %v1863_v49 = vpop.f32.mrf.mxu3 }
 0x590   : > { %v4400_v50 = vadd.f32 %v3349_v9, %v1863_v49 }
 0x591   : > { %v1729_v51 = vrot.slane %v1728_v14, 1 }
 0x592   : > { %1999 = vrot.lane.b32.xlu0 %v4400_v50, %s3821_s15  ;;  %3082 = vmatpush.xpose.msk.msrb.mxu1 %vm1113_vm2, %v4400_v50 }
 0x593   : > { %v1730_v52 = vadd.f32 %v1729_v51, %v1728_v14  ;;  %v3350_v14 = vld [vmem:[%s4661_s7] ss:$0 sm:$0xff] }
 0x595   : > { %v1732_v53 = vmul.f32 0.00390625, %v1730_v52 }
 0x597   : > { %v4369_v54 = vsub.f32 %v1710_v36, %v1732_v53 }
 0x599   : > { %v1736_v55 = vmul.f32 %v4369_v54, %v4369_v54 }
 0x59b   : > { %v1740_v56 = vsel %vm1078_vm1, %v1736_v55, 0.0 }
 0x59c   : > { %1741 = vadd.xlane.f32.xlu2 %v1740_v56 }
 0x5b4   : > { %2139 = vrot.lane.b32.xlu2 %v4400_v50, %s3823_s20 }
 0x5cb   : > { %v1739_v0 = vpop.xlane.xlu1 %1738 }
 0x5cc   : > { %v1743_v1 = vrot.slane %v1739_v0, 4 }
 0x5ce   : > { %v1744_v4 = vadd.f32 %v1743_v1, %v1739_v0 }
 0x5d0   : > { %v1745_v10 = vrot.slane %v1744_v4, 2 }
 0x5d2   : > { %v1746_v13 = vadd.f32 %v1745_v10, %v1744_v4 }
 0x5d4   : > { %v1747_v15 = vrot.slane %v1746_v13, 1 }
 0x5d6   : > { %v1748_v16 = vadd.f32 %v1747_v15, %v1746_v13 }
 0x5d8   : > { %v1755_v17 = vmul.f32 0.00390625, %v1748_v16 }
 0x5da   : > { %v1757_v18 = vadd.f32 1e-05, %v1755_v17 }
 0x5dc   : > { %3386 = vrsqrt.f32 %v1757_v18  ;;  %vm1765_vm7 = vweird.f32 %v1757_v18 }
 0x5e2   : > { %v3387_v19 = vpop.eup %3386 }
 0x5e3   : > { %v1760_v20 = vmul.f32 %v3387_v19, %v1757_v18  ;;  %vm1766_vm6 = vweird.f32 %v3387_v19 }
 0x5e4   : > { %vm1767_vm8 = vmor %vm1765_vm7, %vm1766_vm6 }
 0x5e5   : > { %v1761_v21 = vmul.f32 %v3387_v19, %v1760_v20 }
 0x5e7   : > { %v1762_v22 = vmul.f32 0.5, %v1761_v21 }
 0x5e9   : > { %v1763_v23 = vsub.f32 1.5, %v1762_v22 }
 0x5eb   : > { %v1764_v24 = vmul.f32 %v3387_v19, %v1763_v23 }
 0x5ed   : > { %v1768_v25 = vsel %vm1767_vm8, %v3387_v19, %v1764_v24 }
 0x5ee   : > { %v1779_v27 = vmul.f32 %v1768_v25, %v1733_v46 }
 0x5f0   : > { %v1781_v29 = vmul.f32 %v1779_v27, %v1711_v26 }
 0x5f2   : > { %v4385_v30 = vadd.f32 %v1781_v29, %v1712_v28 }
 0x5f4   : > { %3078 = vmatmul.msk.f32.vlgmr.msra.gmra.mxu0 %vm1078_vm1, %v4385_v30 }
 0x604   : > { %v2000_v59 = vpop.permute.xlu0 %1999 }
 0x605   : > { %3088 = vmatpush.xpose.msk.msra.mxu3 %vm1113_vm2, %v2000_v59 }
 0x60f   : > { %v1742_v32 = vpop.xlane.xlu2 %1741 }
 0x610   : > { %v1749_v12 = vrot.slane %v1742_v32, 4 }
 0x612   : > { %v1750_v33 = vadd.f32 %v1749_v12, %v1742_v32 }
 0x614   : > { %v1751_v34 = vrot.slane %v1750_v33, 2 }
 0x616   : > { %v1752_v35 = vadd.f32 %v1751_v34, %v1750_v33 }
 0x617   : > { %v2140_v61 = vpop.permute.xlu2 %2139 }
 0x618   : > { %v1753_v36 = vrot.slane %v1752_v35, 1  ;;  %3094 = vmatpush.xpose.msk.msrb.mxu3 %vm1113_vm2, %v2140_v61 }
 0x61a   : > { %v1754_v37 = vadd.f32 %v1753_v36, %v1752_v35 }
 0x61c   : > { %v1756_v38 = vmul.f32 0.00390625, %v1754_v37 }
 0x61e   : > { %v1758_v39 = vadd.f32 1e-05, %v1756_v38 }
 0x620   : > { %3388 = vrsqrt.f32 %v1758_v39  ;;  %vm1775_vm10 = vweird.f32 %v1758_v39 }
 0x626   : > { %v3389_v40 = vpop.eup %3388 }
 0x627   : > { %v1770_v41 = vmul.f32 %v3389_v40, %v1758_v39  ;;  %vm1776_vm9 = vweird.f32 %v3389_v40 }
 0x628   : > { %vm1777_vm11 = vmor %vm1775_vm10, %vm1776_vm9 }
 0x629   : > { %v1771_v42 = vmul.f32 %v3389_v40, %v1770_v41 }
 0x62b   : > { %v1772_v43 = vmul.f32 0.5, %v1771_v42 }
 0x62d   : > { %v1773_v44 = vsub.f32 1.5, %v1772_v43 }
 0x62f   : > { %v1774_v45 = vmul.f32 %v3389_v40, %v1773_v44 }
 0x631   : > { %v1778_v46 = vsel %vm1777_vm11, %v3389_v40, %v1774_v45 }
 0x632   : > { %v1780_v8 = vmul.f32 %v1778_v46, %v4369_v54  ;;  %v1866_v54 = vpop.f32.mrf.mxu3 }
 0x633   : > { %v4419_v55 = vadd.f32 %v3349_v9, %v1866_v54 }
 0x634   : > { %v1782_v47 = vmul.f32 %v1780_v8, %v1711_v26 }
 0x635   : > { %2027 = vrot.lane.b32.xlu2 %v4419_v55, %s3821_s15  ;;  %3084 = vmatpush.xpose.msk.msra.mxu1 %vm1113_vm2, %v4419_v55  ;;  %v4436_v60 = vpack.i.bf16 %v4419_v55, %v4400_v50 }
 0x636   : > { %v4391_v48 = vadd.f32 %v1782_v47, %v1712_v28 }
 0x638   : > { %3079 = vmatmul.msk.f32.gmra.mxu0 %vm1078_vm1, %v4391_v48 }
 0x671   : > { %v1820_v51 = vpop.f32.mrf.mxu0 }
 0x672   : > { %v1821_v52 = vadd.f32 %v3350_v14, %v1820_v51 }
 0x674   : > { %v1826_v53 = vmul.f32 0.35355338, %v1821_v52 }
 0x676   : > { %2137 = vrot.lane.b32.xlu0 %v1826_v53, %s3823_s20  ;;  %1997 = vrot.lane.b32.xlu1 %v1826_v53, %s3821_s15 }
 0x677   : > { %3083 = vmatmul.msk.f32.vlgmr.msrb.gmra.mxu1 %vm1113_vm2, %v1826_v53 }
 0x67e   : > { %2277 = vrot.lane.b32.xlu0 %v1826_v53, %s3824_s0  ;;  %2279 = vrot.lane.b32.xlu1 %v4400_v50, %s3824_s0 }
 0x686   : > { %2167 = vrot.lane.b32.xlu0 %v4419_v55, %s3823_s20 }
 0x68f   : > { %v2028_v62 = vpop.permute.xlu2 %2027 }
 0x690   : > { %3090 = vmatpush.xpose.msk.msrb.mxu1 %vm1113_vm2, %v2028_v62 }
 0x6b5   : > { %v1823_v56 = vpop.f32.mrf.mxu0 }
 0x6b6   : > { %v1824_v57 = vadd.f32 %v3350_v14, %v1823_v56 }
 0x6b8   : > { %v1827_v58 = vmul.f32 0.35355338, %v1824_v57 }
 0x6ba   : > { %2305 = vrot.lane.b32.xlu0 %v1827_v58, %s3824_s0  ;;  %2165 = vrot.lane.b32.xlu2 %v1827_v58, %s3823_s20 }
 0x6bb   : > { %2025 = vrot.lane.b32.xlu1 %v1827_v58, %s3821_s15  ;;  %3085 = vmatmul.msk.f32.vlgmr.msra.gmra.mxu1 %vm1113_vm2, %v1827_v58 }
 0x6c3   : > { %2307 = vrot.lane.b32.xlu1 %v4419_v55, %s3824_s0 }
 0x6cb   : > { %3338 = vrot.lane.b32.xlu1 %v4436_v60, %s3819_s9  ;;  %s4664_s9 = sld [smem:[#allocation39_spill]] }
 0x6e8   : > { %v1998_v63 = vpop.permute.xlu1 %1997  ;;  %v2138_v0 = vpop.permute.xlu0 %2137 }
 0x6e9   : > { %3089 = vmatmul.msk.f32.vlgmr.msra.gmra.mxu3 %vm1113_vm2, %v1998_v63 }
 0x6f0   : > { %v2280_v1 = vpop.permute.xlu1 %2279  ;;  %v2278_v4 = vpop.permute.xlu0 %2277 }
 0x6f1   : > { %3095 = vmatmul.msk.f32.vlgmr.msrb.gmra.mxu3 %vm1113_vm2, %v2138_v0 }
 0x6f2   : > { %3100 = vmatpush.xpose.msk.msra.mxu3 %vm1113_vm2, %v2280_v1 }
 0x6f4   : > { %v1892_v3 = vpop.f32.mrf.mxu1 }
 0x6f5   : > { %v1893_v5 = vadd.f32 %v1892_v3, %v1065_v2 }
 0x6f7   : > { %v1921_v6 = vsel %vm1113_vm2, %v1893_v5, -inf }
 0x6f8   : > { %1922 = vmax.xlane.f32.xlu2 %v1921_v6  ;;  %v2168_v7 = vpop.permute.xlu0 %2167 }
 0x6f9   : > { %3101 = vmatmul.msk.f32.vlgmr.msra.gmra.mxu3 %vm1113_vm2, %v2278_v4  ;;  %3096 = vmatpush.xpose.msk.msra.mxu1 %vm1113_vm2, %v2168_v7 }
 0x714   : > { %v2166_v11 = vpop.permute.xlu2 %2165 }
 0x72c   : > { %v2306_v18 = vpop.permute.xlu0 %2305 }
 0x72d   : > { %v2026_v10 = vpop.permute.xlu1 %2025 }
 0x72e   : > { %3091 = vmatmul.msk.f32.vlgmr.msrb.gmra.mxu1 %vm1113_vm2, %v2026_v10 }
 0x735   : > { %v2308_v13 = vpop.permute.xlu1 %2307 }
 0x736   : > { %3097 = vmatmul.msk.f32.vlgmr.msra.gmra.mxu1 %vm1113_vm2, %v2166_v11 }
 0x737   : > { %3102 = vmatpush.xpose.msk.msrb.mxu1 %vm1113_vm2, %v2308_v13 }
 0x738   : > { %v1918_v15 = vpop.f32.mrf.mxu1 }
 0x739   : > { %v1919_v16 = vadd.f32 %v1918_v15, %v1065_v2 }
 0x73b   : > { %v1924_v17 = vsel %vm1113_vm2, %v1919_v16, -inf }
 0x73c   : > { %1925 = vmax.xlane.f32.xlu0 %v1924_v17 }
 0x73d   : > { %v3339_v19 = vpop.permute.xlu1 %3338 }
 0x73e   : > { %v3341_v20 = vunpack.i.h.bf16 %v3339_v19  ;;  %v3340_v21 = vunpack.i.l.bf16 %v3339_v19  ;;  %3103 = vmatmul.msk.f32.vlgmr.msrb.gmra.mxu1 %vm1113_vm2, %v2306_v18 }
 0x740   : > { %1964 = vmatpush.msra.mxu2 %v3340_v21  ;;  %1990 = vmatpush.msrb.mxu0 %v3341_v20 }
 0x76b   : > { %v1923_v22 = vpop.xlane.xlu2 %1922 }
 0x76c   : > { %v1927_v23 = vsub.f32 %v1893_v5, %v1923_v22  ;;  %v2022_v24 = vpop.f32.mrf.mxu3 }
 0x76d   : > { %v2023_v25 = vadd.f32 %v2022_v24, %v1065_v2 }
 0x76e   : > { %v1929_v26 = vmul.f32 1.442695, %v1927_v23 }
 0x76f   : > { %v2053_v27 = vsel %vm1113_vm2, %v2023_v25, -inf }
 0x770   : > { %3390 = vpow2.f32 %v1929_v26  ;;  %2054 = vmax.xlane.f32.xlu1 %v2053_v27 }
 0x774   : > { %v2162_v28 = vpop.f32.mrf.mxu3 }
 0x775   : > { %v2163_v29 = vadd.f32 %v2162_v28, %v1065_v2 }
 0x776   : > { %v3391_v31 = vpop.eup %3390 }
 0x777   : > { %v1933_v32 = vsel %vm1113_vm2, %v3391_v31, 0.0  ;;  %v2193_v12 = vsel %vm1113_vm2, %v2163_v29, -inf }
 0x778   : > { %1934 = vadd.xlane.f32.xlu0 %v1933_v32  ;;  %2194 = vmax.xlane.f32.xlu2 %v2193_v12 }
 0x77c   : > { %v2302_v33 = vpop.f32.mrf.mxu3 }
 0x77d   : > { %v4456_v34 = vadd.f32 %v2302_v33, %v1065_v2 }
 0x77f   : > { %v2333_v35 = vsel %vm1113_vm2, %v4456_v34, -inf }
 0x780   : > { %2334 = vmax.xlane.f32.xlu0 %v2333_v35 }
 0x7ab   : > { %v2050_v36 = vpop.f32.mrf.mxu1 }
 0x7ac   : > { %v2051_v37 = vadd.f32 %v2050_v36, %v1065_v2 }
 0x7ae   : > { %v2056_v38 = vsel %vm1113_vm2, %v2051_v37, -inf }
 0x7af   : > { %v1926_v39 = vpop.xlane.xlu0 %1925  ;;  %2057 = vmax.xlane.f32.xlu1 %v2056_v38 }
 0x7b0   : > { %v1928_v40 = vsub.f32 %v1919_v16, %v1926_v39 }
 0x7b2   : > { %v1931_v41 = vmul.f32 1.442695, %v1928_v40 }
 0x7b3   : > { %v2190_v42 = vpop.f32.mrf.mxu1 }
 0x7b4   : > { %3392 = vpow2.f32 %v1931_v41  ;;  %v2191_v43 = vadd.f32 %v2190_v42, %v1065_v2 }
 0x7b6   : > { %v2196_v44 = vsel %vm1113_vm2, %v2191_v43, -inf }
 0x7b7   : > { %2197 = vmax.xlane.f32.xlu2 %v2196_v44 }
 0x7ba   : > { %v3393_v45 = vpop.eup %3392 }
 0x7bb   : > { %v2330_v46 = vpop.f32.mrf.mxu1  ;;  %v1936_v8 = vsel %vm1113_vm2, %v3393_v45, 0.0 }
 0x7bc   : > { %v2331_v47 = vadd.f32 %v2330_v46, %v1065_v2  ;;  %1937 = vadd.xlane.f32.xlu0 %v1936_v8 }
 0x7be   : > { %v2336_v9 = vsel %vm1113_vm2, %v2331_v47, -inf }
 0x7bf   : > { %2337 = vmax.xlane.f32.xlu1 %v2336_v9 }
 0x7d0   : > { %3343 = vrot.lane.b32.xlu0 %v4436_v60, %s3818_s28 }
 0x7d8   : > { %2215 = vrot.lane.b32.xlu1 %v4400_v50, %s3820_s6  ;;  %2355 = vrot.lane.b32.xlu0 %v4400_v50, %s3822_s14 }
 0x7e0   : > { %2381 = vrot.lane.b32.xlu0 %v4419_v55, %s3822_s14  ;;  %s4666_s14 = sld [smem:[#allocation41_spill]] }
 0x7e3   : > { %v2055_v49 = vpop.xlane.xlu1 %2054 }
 0x7e4   : > { %v2059_v14 = vsub.f32 %v2023_v25, %v2055_v49 }
 0x7e6   : > { %v2061_v51 = vmul.f32 1.442695, %v2059_v14  ;;  %s4667_s20 = scalar_lea.vmem %s4666_s14, %s4188_s13 }
 0x7e8   : > { %3394 = vpow2.f32 %v2061_v51 }
 0x7eb   : > { %v1935_v52 = vpop.xlane.xlu0 %1934  ;;  %v2195_v58 = vpop.xlane.xlu2 %2194 }
 0x7ec   : > { %3396 = vrcp.f32 %v1935_v52  ;;  %v2199_v60 = vsub.f32 %v2163_v29, %v2195_v58  ;;  %v3195_v58 = vld [vmem:[%s891_s26 + $0x8] sm:$0xff]  }
 0x7ee   : > { %v3395_v53 = vpop.eup %3394  ;;  %v2201_v63 = vmul.f32 1.442695, %v2199_v60  ;;  %v3160_v60 = vld [vmem:[%s891_s26] sm:$0xff]   ;;  %s4662_s26 = sld [smem:[#allocation36_spill]] }
 0x7ef   : > { %v2065_v54 = vsel %vm1113_vm2, %v3395_v53, 0.0 }
 0x7f0   : > { %2066 = vadd.xlane.f32.xlu2 %v2065_v54 }
 0x7f2   : > { %v3397_v56 = vpop.eup %3396 }
 0x7f3   : > { %v1941_v57 = vmul.f32 %v3397_v56, %v3391_v31  ;;  %v2335_v62 = vpop.xlane.xlu0 %2334 }
 0x7f4   : > { %v2339_v11 = vsub.f32 %v4456_v34, %v2335_v62  ;;  %v3161_v62 = vunpack.c.l.bf16 %v3160_v60  ;;  %s4663_s28 = scalar_lea.vmem %s4662_s26, %s4188_s13 }
 0x7f5   : > { %3086 = vmatmul.msk.f32.vlgmr.msra.gmra.mxu2 %vm1113_vm2, %v1941_v57 }
 0x7f6   : > { %v2341_v18 = vmul.f32 1.442695, %v2339_v11 }
 0x822   : > { %v2058_v59 = vpop.xlane.xlu1 %2057 }
 0x823   : > { %v2060_v50 = vsub.f32 %v2051_v37, %v2058_v59  ;;  %v3166_v59 = vunpack.c.h.bf16 %v3195_v58 }
 0x825   : > { %v2063_v61 = vmul.f32 1.442695, %v2060_v50  ;;  %v3165_v50 = vunpack.c.l.bf16 %v3195_v58  ;;  %2449 = vmatpush.msrb.mxu3 %v3166_v59 }
 0x827   : > { %3398 = vpow2.f32 %v2063_v61  ;;  %v3162_v61 = vunpack.c.h.bf16 %v3160_v60  ;;  %2450 = vmatpush.msrb.mxu3 %v3165_v50 }
 0x828   : > { %3400 = vpow2.f32 %v2201_v63 }
 0x829   : > { %2451 = vmatpush.msrb.mxu3 %v3162_v61  ;;  %v3199_v61 = vld [vmem:[%s4229_s3 + $0x18] sm:$0xff]  }
 0x82a   : > { %v2198_v0 = vpop.xlane.xlu2 %2197 }
 0x82b   : > { %v2200_v2 = vsub.f32 %v2191_v43, %v2198_v0  ;;  %2452 = vmatpush.msrb.mxu3 %v3161_v62  ;;  %v3198_v62 = vld [vmem:[%s4229_s3 + $0x10] sm:$0xff]  }
 0x82d   : > { %v3399_v1 = vpop.eup %3398  ;;  %v2203_v5 = vmul.f32 1.442695, %v2200_v2 }
 0x82e   : > { %v2068_v3 = vsel %vm1113_vm2, %v3399_v1, 0.0  ;;  %v3401_v7 = vpop.eup %3400 }
 0x82f   : > { %2069 = vadd.xlane.f32.xlu2 %v2068_v3  ;;  %v1938_v4 = vpop.xlane.xlu0 %1937  ;;  %v2205_v16 = vsel %vm1113_vm2, %v3401_v7, 0.0 }
 0x830   : > { %3402 = vrcp.f32 %v1938_v4 }
 0x831   : > { %3404 = vpow2.f32 %v2203_v5 }
 0x832   : > { %v2338_v6 = vpop.xlane.xlu1 %2337 }
 0x833   : > { %v2340_v10 = vsub.f32 %v2331_v47, %v2338_v6  ;;  %v3351_v6 = vld [vmem:[%s4663_s28] ss:$0 sm:$0xff] }
 0x835   : > { %v2343_v13 = vmul.f32 1.442695, %v2340_v10 }
 0x836   : > { %v3403_v15 = vpop.eup %3402 }
 0x837   : > { %v1942_v17 = vmul.f32 %v3403_v15, %v3393_v45  ;;  %3406 = vpow2.f32 %v2343_v13  ;;  %2206 = vadd.xlane.f32.xlu2 %v2205_v16  ;;  %v3405_v19 = vpop.eup %3404 }
 0x838   : > { %3408 = vpow2.f32 %v2341_v18  ;;  %v2208_v22 = vsel %vm1113_vm2, %v3405_v19, 0.0 }
 0x839   : > { %3087 = vmatmul.msk.f32.vlgmr.msrb.gmra.mxu0 %vm1113_vm2, %v1942_v17 }
 0x83d   : > { %v3407_v20 = vpop.eup %3406 }
 0x83e   : > { %v2348_v21 = vsel %vm1113_vm2, %v3407_v20, 0.0  ;;  %v3409_v24 = vpop.eup %3408 }
 0x83f   : > { %2349 = vadd.xlane.f32.xlu1 %v2348_v21  ;;  %2209 = vadd.xlane.f32.xlu2 %v2208_v22  ;;  %v2345_v27 = vsel %vm1113_vm2, %v3409_v24, 0.0 }
 0x842   : > { %v3344_v23 = vpop.permute.xlu0 %3343 }
 0x843   : > { %v3346_v25 = vunpack.i.h.bf16 %v3344_v23  ;;  %v3345_v26 = vunpack.i.l.bf16 %v3344_v23 }
 0x845   : > { %2096 = vmatpush.msrb.mxu2 %v3345_v26  ;;  %2122 = vmatpush.msra.mxu0 %v3346_v25 }
 0x847   : > { %2346 = vadd.xlane.f32.xlu2 %v2345_v27 }
 0x84a   : > { %v2216_v28 = vpop.permute.xlu1 %2215  ;;  %v2356_v12 = vpop.permute.xlu0 %2355 }
 0x84b   : > { %2236 = vmatpush.msra.mxu2 %v2216_v28 }
 0x852   : > { %v2382_v47 = vpop.permute.xlu0 %2381 }
 0x85f   : > { %2241 = vrot.lane.b32.xlu2 %v4419_v55, %s3820_s6  ;;  %s4665_s6 = scalar_lea.vmem %s4664_s9, %s4188_s13 }
 0x863   : > { %v2067_v29 = vpop.xlane.xlu2 %2066 }
 0x864   : > { %3410 = vrcp.f32 %v2067_v29 }
 0x86a   : > { %v3411_v31 = vpop.eup %3410 }
 0x86b   : > { %v2073_v32 = vmul.f32 %v3411_v31, %v3395_v53 }
 0x86d   : > { %3092 = vmatmul.msk.f32.vlgmr.msrb.gmra.mxu2 %vm1113_vm2, %v2073_v32 }
 0x86e   : > { %2376 = vmatpush.msrb.mxu2 %v2356_v12 }
 0x878   : > { %v1966_v33 = vpop.f32.mrf.mxu2 }
 0x879   : > { %1995 = vst.msk [vmem:[#allocation2] sm:$0xff] %vm1113_vm2, %v1966_v33 }
 0x8a2   : > { %v2070_v34 = vpop.xlane.xlu2 %2069 }
 0x8a3   : > { %3412 = vrcp.f32 %v2070_v34 }
 0x8a9   : > { %v3413_v35 = vpop.eup %3412 }
 0x8aa   : > { %v2074_v36 = vmul.f32 %v3413_v35, %v3399_v1  ;;  %v2207_v37 = vpop.xlane.xlu2 %2206 }
 0x8ab   : > { %3414 = vrcp.f32 %v2207_v37 }
 0x8ac   : > { %3093 = vmatmul.msk.f32.vlgmr.msra.gmra.mxu0 %vm1113_vm2, %v2074_v36 }
 0x8b1   : > { %v3415_v55 = vpop.eup %3414 }
 0x8b2   : > { %v2213_v38 = vmul.f32 %v3415_v55, %v3401_v7  ;;  %v2210_v39 = vpop.xlane.xlu2 %2209  ;;  %v2350_v42 = vpop.xlane.xlu1 %2349 }
 0x8b3   : > { %3416 = vrcp.f32 %v2210_v39  ;;  %v3196_v39 = vld [vmem:[%s901_s19 + $0x8] sm:$0xff]  }
 0x8b4   : > { %3098 = vmatmul.msk.f32.vlgmr.msra.gmra.mxu2 %vm1113_vm2, %v2213_v38 }
 0x8b6   : > { %v1992_v40 = vpop.f32.mrf.mxu0 }
 0x8b7   : > { %1996 = vst.msk [vmem:[#allocation2 + $0x8] sm:$0xff] %vm1113_vm2, %v1992_v40 }
 0x8b9   : > { %v3417_v43 = vpop.eup %3416 }
 0x8ba   : > { %v2347_v41 = vpop.xlane.xlu2 %2346  ;;  %v2214_v45 = vmul.f32 %v3417_v43, %v3405_v19  ;;  %v3173_v43 = vunpack.c.l.bf16 %v3196_v39 }
 0x8bb   : > { %3418 = vrcp.f32 %v2347_v41  ;;  %v3174_v41 = vunpack.c.h.bf16 %v3196_v39  ;;  %v3353_v39 = vld [vmem:[%s4667_s20] ss:$0 sm:$0xff] }
 0x8bc   : > { %3420 = vrcp.f32 %v2350_v42 }
 0x8bd   : > { %2568 = vmatpush.msra.mxu1 %v3174_v41 }
 0x8bf   : > { %2569 = vmatpush.msra.mxu1 %v3173_v43 }
 0x8c1   : > { %v3419_v44 = vpop.eup %3418 }
 0x8c2   : > { %v2353_v46 = vmul.f32 %v3419_v44, %v3409_v24  ;;  %v2242_v8 = vpop.permute.xlu2 %2241  ;;  %v3421_v9 = vpop.eup %3420  ;;  %v3168_v44 = vld [vmem:[%s901_s19] sm:$0xff]  }
 0x8c3   : > { %2262 = vmatpush.msrb.mxu0 %v2242_v8  ;;  %v2354_v49 = vmul.f32 %v3421_v9, %v3407_v20 }
 0x8c4   : > { %3099 = vmatmul.msk.f32.vlgmr.msrb.gmra.mxu0 %vm1113_vm2, %v2214_v45  ;;  %3104 = vmatmul.msk.f32.vlgmr.msrb.gmra.mxu2 %vm1113_vm2, %v2353_v46  ;;  %v3170_v46 = vunpack.c.h.bf16 %v3168_v44 }
 0x8c5   : > { %2402 = vmatpush.msra.mxu0 %v2382_v47  ;;  %v3169_v47 = vunpack.c.l.bf16 %v3168_v44 }
 0x8c6   : > { %2570 = vmatpush.msra.mxu1 %v3170_v46 }
 0x8c8   : > { %2571 = vmatpush.msra.mxu1 %v3169_v47 }
 0x8cc   : > { %3105 = vmatmul.msk.f32.vlgmr.msra.gmra.mxu0 %vm1113_vm2, %v2354_v49 }
 0x8f0   : > { %v2098_v14 = vpop.f32.mrf.mxu2 }
 0x8f1   : > { %2129 = vrot.lane.b32.xlu0 %v2098_v14, %s3829_s27 }
 0x929   : > { %v2124_v52 = vpop.f32.mrf.mxu0 }
 0x937   : > { %v2238_v51 = vpop.f32.mrf.mxu2 }
 0x938   : > { %2269 = vrot.lane.b32.xlu0 %v2238_v51, %s3830_s29 }
 0x940   : > { %2131 = vrot.lane.b32.xlu0 %v2124_v52, %s3829_s27 }
 0x941   : > { %v2264_v53 = vpop.f32.mrf.mxu0 }
 0x947   : > { %v2378_v54 = vpop.f32.mrf.mxu2 }
 0x948   : > { %2409 = vrot.lane.b32.xlu2 %v2378_v54, %s3831_s23 }
 0x949   : > { %v2404_v56 = vpop.f32.mrf.mxu0 }
 0x94a   : > { %2411 = vrot.lane.b32.xlu0 %v2404_v56, %s3831_s23 }
 0x950   : > { %2271 = vrot.lane.b32.xlu2 %v2264_v53, %s3830_s29  ;;  %s4668_s29 = sld [smem:[#allocation42_spill]] }
 0x956   : > { %s2718_s23 = sshll.u32 %s4668_s29, 4  ;;  %s2719_s23 = int_to_ptr.hbm [resolvable:$true] %s2718_s23 }
 0x963   : > { %v2130_v57 = vpop.permute.xlu0 %2129 }
 0x964   : > { %2135 = vst.msk [vmem:[#allocation2] sm:$0xff] %vm1381_vm3, %v2130_v57 }
 0x9a2   : > { %v2410_v63 = vpop.permute.xlu2 %2409 }
 0x9aa   : > { %v2270_v0 = vpop.permute.xlu0 %2269  ;;  %v2272_v2 = vpop.permute.xlu2 %2271 }
 0x9ab   : > { %2275 = vst.msk [vmem:[#allocation2] sm:$0xff] %vm1522_vm4, %v2270_v0  ;;  %v3189_v0 = vunpack.c.l.bf16 %v3199_v61 }
 0x9ac   : > { %2415 = vst.msk [vmem:[#allocation2] sm:$0xff] %vm1663_vm5, %v2410_v63  ;;  %v3190_v63 = vunpack.c.h.bf16 %v3199_v61 }
 0x9ae   : > { %2616 = vmatpush.msra.mxu2 %v3190_v63 }
 0x9b0   : > { %2617 = vmatpush.msra.mxu2 %v3189_v0 }
 0x9b2   : > { %v2132_v1 = vpop.permute.xlu0 %2131 }
 0x9b3   : > { %2136 = vst.msk [vmem:[#allocation2 + $0x8] sm:$0xff] %vm1381_vm3, %v2132_v1  ;;  %v2417_v3 = vld [vmem:[#allocation2] sm:$0xff]  ;;  %vm2601_vm3 = vcmask 523264  }
 0x9b4   : > { %2276 = vst.msk [vmem:[#allocation2 + $0x8] sm:$0xff] %vm1522_vm4, %v2272_v2  ;;  %3106 = vmatmul.msk.f32.vlgmr.msrb.gmra.mxu3 %vm1078_vm1, %v2417_v3  ;;  %v3186_v3 = vunpack.c.h.bf16 %v3198_v62 }
 0x9b6   : > { %2618 = vmatpush.msra.mxu2 %v3186_v3 }
 0x9bc   : > { %v2412_v4 = vpop.permute.xlu0 %2411 }
 0x9bd   : > { %2416 = vst.msk [vmem:[#allocation2 + $0x8] sm:$0xff] %vm1663_vm5, %v2412_v4 }
 0x9c4   : > { %v2418_v5 = vld [vmem:[#allocation2 + $0x8] sm:$0xff] }
 0x9c5   : > { %3107 = vmatmul.msk.f32.gmra.mxu3 %vm1078_vm1, %v2418_v5 }
 0xa37   : > { %v2454_v7 = vpop.f32.mrf.mxu3 }
 0xa38   : > { %v2455_v10 = vadd.f32 %v3351_v6, %v2454_v7  ;;  %v3185_v7 = vunpack.c.l.bf16 %v3198_v62 }
 0xa3a   : > { %v2460_v11 = vadd.f32 %v2455_v10, %v4385_v30  ;;  %2619 = vmatpush.msra.mxu2 %v3185_v7 }
 0xa3c   : > { %v2466_v13 = vsel %vm1078_vm1, %v2460_v11, 0.0 }
 0xa3d   : > { %2467 = vadd.xlane.f32.xlu2 %v2466_v13 }
 0xa48   : > { %v2457_v15 = vpop.f32.mrf.mxu3 }
 0xa49   : > { %v2458_v16 = vadd.f32 %v3351_v6, %v2457_v15  ;;  %v3197_v6 = vld [vmem:[%s4229_s3 + $0x8] sm:$0xff]  }
 0xa4a   : > { %v3182_v13 = vunpack.c.h.bf16 %v3197_v6 }
 0xa4b   : > { %v2461_v17 = vadd.f32 %v2458_v16, %v4391_v48  ;;  %v3108_v16 = vld [vmem:[%s4219_s8 + $0x8] sm:$0xff] }
 0xa4c   : > { %2620 = vmatpush.msra.mxu2 %v3182_v13 }
 0xa4d   : > { %v2469_v18 = vsel %vm1078_vm1, %v2461_v17, 0.0 }
 0xa4e   : > { %2470 = vadd.xlane.f32.xlu1 %v2469_v18  ;;  %v3109_v18 = vld [vmem:[%s4224_s17 + $0x8] sm:$0xff] }
 0xab0   : > { %v2468_v19 = vpop.xlane.xlu2 %2467 }
 0xab1   : > { %v2472_v20 = vrot.slane %v2468_v19, 4 }
 0xab3   : > { %v2473_v21 = vadd.f32 %v2472_v20, %v2468_v19 }
 0xab5   : > { %v2474_v22 = vrot.slane %v2473_v21, 2 }
 0xab7   : > { %v2475_v23 = vadd.f32 %v2474_v22, %v2473_v21 }
 0xab9   : > { %v2476_v24 = vrot.slane %v2475_v23, 1 }
 0xabb   : > { %v2477_v25 = vadd.f32 %v2476_v24, %v2475_v23 }
 0xabd   : > { %v2484_v26 = vmul.f32 0.00390625, %v2477_v25 }
 0xabf   : > { %v4518_v27 = vsub.f32 %v2460_v11, %v2484_v26 }
 0xac1   : > { %v2471_v30 = vpop.xlane.xlu1 %2470  ;;  %v2488_v28 = vmul.f32 %v4518_v27, %v4518_v27 }
 0xac2   : > { %v2478_v29 = vrot.slane %v2471_v30, 4 }
 0xac3   : > { %v2490_v48 = vsel %vm1078_vm1, %v2488_v28, 0.0 }
 0xac4   : > { %v2479_v31 = vadd.f32 %v2478_v29, %v2471_v30  ;;  %2491 = vadd.xlane.f32.xlu0 %v2490_v48  ;;  %v3181_v48 = vunpack.c.l.bf16 %v3197_v6 }
 0xac6   : > { %v2480_v32 = vrot.slane %v2479_v31, 2  ;;  %2621 = vmatpush.msra.mxu2 %v3181_v48 }
 0xac8   : > { %v2481_v12 = vadd.f32 %v2480_v32, %v2479_v31  ;;  %v3176_v31 = vld [vmem:[%s4229_s3] sm:$0xff]  }
 0xac9   : > { %v3178_v32 = vunpack.c.h.bf16 %v3176_v31 }
 0xaca   : > { %v2482_v33 = vrot.slane %v2481_v12, 1 }
 0xacb   : > { %2622 = vmatpush.msra.mxu2 %v3178_v32  ;;  %v3114_v32 = vld [vmem:[%s4219_s8 + $0x10] sm:$0xff]  ;;  %s3832_s8 = smov [#allocation17]  }
 0xacc   : > { %v2483_v34 = vadd.f32 %v2482_v33, %v2481_v12  ;;  %v3177_v12 = vunpack.c.l.bf16 %v3176_v31  ;;  %v3352_v33 = vld [vmem:[%s4665_s6] ss:$0 sm:$0xff]  ;;  %s2716_s13 = sshll.u32 %s3832_s8, 4  ;;  %s2717_s13 = int_to_ptr.vmem [resolvable:$true] %s2716_s13 }
 0xace   : > { %v2485_v35 = vmul.f32 0.00390625, %v2483_v34  ;;  %2623 = vmatpush.msra.mxu2 %v3177_v12 }
 0xad0   : > { %v4523_v36 = vsub.f32 %v2461_v17, %v2485_v35 }
 0xad2   : > { %v2489_v37 = vmul.f32 %v4523_v36, %v4523_v36 }
 0xad4   : > { %v2493_v55 = vsel %vm1078_vm1, %v2489_v37, 0.0 }
 0xad5   : > { %2494 = vadd.xlane.f32.xlu1 %v2493_v55 }
 0xb37   : > { %v2492_v38 = vpop.xlane.xlu0 %2491 }
 0xb38   : > { %v2496_v40 = vrot.slane %v2492_v38, 4 }
 0xb3a   : > { %v2497_v42 = vadd.f32 %v2496_v40, %v2492_v38 }
 0xb3c   : > { %v2498_v45 = vrot.slane %v2497_v42, 2 }
 0xb3e   : > { %v2499_v8 = vadd.f32 %v2498_v45, %v2497_v42 }
 0xb40   : > { %v2500_v9 = vrot.slane %v2499_v8, 1 }
 0xb42   : > { %v2501_v49 = vadd.f32 %v2500_v9, %v2499_v8 }
 0xb44   : > { %v2508_v14 = vmul.f32 0.00390625, %v2501_v49 }
 0xb46   : > { %v2510_v51 = vadd.f32 1e-05, %v2508_v14 }
 0xb48   : > { %3422 = vrsqrt.f32 %v2510_v51  ;;  %v2495_v52 = vpop.xlane.xlu1 %2494  ;;  %vm2518_vm13 = vweird.f32 %v2510_v51 }
 0xb49   : > { %v2502_v53 = vrot.slane %v2495_v52, 4 }
 0xb4b   : > { %v2503_v54 = vadd.f32 %v2502_v53, %v2495_v52 }
 0xb4d   : > { %v2504_v56 = vrot.slane %v2503_v54, 2 }
 0xb4e   : > { %v3423_v57 = vpop.eup %3422 }
 0xb4f   : > { %v2513_v58 = vmul.f32 %v3423_v57, %v2510_v51  ;;  %v2505_v59 = vadd.f32 %v2504_v56, %v2503_v54  ;;  %vm2519_vm12 = vweird.f32 %v3423_v57 }
 0xb50   : > { %vm2520_vm14 = vmor %vm2518_vm13, %vm2519_vm12 }
 0xb51   : > { %v2514_v50 = vmul.f32 %v3423_v57, %v2513_v58  ;;  %v2506_v60 = vrot.slane %v2505_v59, 1 }
 0xb53   : > { %v2515_v1 = vmul.f32 0.5, %v2514_v50  ;;  %v2507_v2 = vadd.f32 %v2506_v60, %v2505_v59 }
 0xb55   : > { %v2516_v4 = vsub.f32 1.5, %v2515_v1  ;;  %v2509_v5 = vmul.f32 0.00390625, %v2507_v2 }
 0xb57   : > { %v2517_v10 = vmul.f32 %v3423_v57, %v2516_v4  ;;  %v2511_v11 = vadd.f32 1e-05, %v2509_v5 }
 0xb59   : > { %v2521_v15 = vsel %vm2520_vm14, %v3423_v57, %v2517_v10  ;;  %3424 = vrsqrt.f32 %v2511_v11  ;;  %vm2528_vm0 = vweird.f32 %v2511_v11 }
 0xb5a   : > { %v2532_v17 = vmul.f32 %v2521_v15, %v4518_v27 }
 0xb5c   : > { %v2534_v19 = vmul.f32 %v3108_v16, %v2532_v17 }
 0xb5e   : > { %v2536_v20 = vadd.f32 %v3109_v18, %v2534_v19 }
 0xb5f   : > { %v3425_v21 = vpop.eup %3424 }
 0xb60   : > { %v2523_v22 = vmul.f32 %v3425_v21, %v2511_v11  ;;  %3110 = vmatmul.msk.f32.vlgmr.msra.gmra.mxu1 %vm1078_vm1, %v2536_v20  ;;  %vm2529_vm15 = vweird.f32 %v3425_v21 }
 0xb61   : > { %vm2530_vm2 = vmor %vm2528_vm0, %vm2529_vm15 }
 0xb62   : > { %v2524_v23 = vmul.f32 %v3425_v21, %v2523_v22 }
 0xb64   : > { %v2525_v24 = vmul.f32 0.5, %v2524_v23 }
 0xb66   : > { %v2526_v25 = vsub.f32 1.5, %v2525_v24 }
 0xb68   : > { %v2527_v26 = vmul.f32 %v3425_v21, %v2526_v25 }
 0xb6a   : > { %v2531_v30 = vsel %vm2530_vm2, %v3425_v21, %v2527_v26 }
 0xb6b   : > { %v2533_v27 = vmul.f32 %v2531_v30, %v4523_v36 }
 0xb6d   : > { %v2535_v28 = vmul.f32 %v3108_v16, %v2533_v27 }
 0xb6f   : > { %v2537_v29 = vadd.f32 %v3109_v18, %v2535_v28 }
 0xb71   : > { %3111 = vmatmul.msk.f32.gmra.mxu1 %vm1078_vm1, %v2537_v29 }
 0xbdd   : > { %v2573_v34 = vpop.f32.mrf.mxu1 }
 0xbde   : > { %v2574_v35 = vadd.f32 %v3352_v33, %v2573_v34  ;;  %v3115_v34 = vld [vmem:[%s4224_s17 + $0x10] sm:$0xff] }
 0xbe0   : > { %v2579_v36 = vmax.f32 %v2574_v35, 0.0 }
 0xbe2   : > { %3112 = vmatmul.msk.f32.vlgmr.msra.gmra.mxu2 %vm2601_vm3, %v2579_v36 }
 0xbee   : > { %v2576_v37 = vpop.f32.mrf.mxu1 }
 0xbef   : > { %v2577_v55 = vadd.f32 %v3352_v33, %v2576_v37 }
 0xbf1   : > { %v2580_v38 = vmax.f32 %v2577_v55, 0.0 }
 0xbf3   : > { %3113 = vmatmul.msk.f32.gmra.mxu2 %vm2601_vm3, %v2580_v38 }
 0xc65   : > { %v2625_v40 = vpop.f32.mrf.mxu2 }
 0xc66   : > { %v2626_v41 = vadd.f32 %v3353_v39, %v2625_v40 }
 0xc68   : > { %v2631_v42 = vadd.f32 %v2626_v41, %v2536_v20 }
 0xc6a   : > { %v2637_v43 = vsel %vm1078_vm1, %v2631_v42, 0.0 }
 0xc6b   : > { %2638 = vadd.xlane.f32.xlu1 %v2637_v43 }
 0xc76   : > { %v2628_v44 = vpop.f32.mrf.mxu2 }
 0xc77   : > { %v2629_v45 = vadd.f32 %v3353_v39, %v2628_v44 }
 0xc79   : > { %v2632_v46 = vadd.f32 %v2629_v45, %v2537_v29 }
 0xc7b   : > { %v2640_v8 = vsel %vm1078_vm1, %v2632_v46, 0.0 }
 0xc7c   : > { %2641 = vadd.xlane.f32.xlu1 %v2640_v8 }
 0xcde   : > { %v2639_v47 = vpop.xlane.xlu1 %2638 }
 0xcdf   : > { %v2643_v9 = vrot.slane %v2639_v47, 4 }
 0xce1   : > { %v2644_v49 = vadd.f32 %v2643_v9, %v2639_v47 }
 0xce3   : > { %v2645_v14 = vrot.slane %v2644_v49, 2 }
 0xce5   : > { %v2646_v51 = vadd.f32 %v2645_v14, %v2644_v49 }
 0xce7   : > { %v2647_v52 = vrot.slane %v2646_v51, 1 }
 0xce9   : > { %v2648_v53 = vadd.f32 %v2647_v52, %v2646_v51 }
 0xceb   : > { %v2655_v54 = vmul.f32 0.00390625, %v2648_v53 }
 0xced   : > { %v2657_v56 = vsub.f32 %v2631_v42, %v2655_v54 }
 0xcef   : > { %v2642_v57 = vpop.xlane.xlu1 %2641  ;;  %v2659_v58 = vmul.f32 %v2657_v56, %v2657_v56 }
 0xcf0   : > { %v2649_v59 = vrot.slane %v2642_v57, 4 }
 0xcf1   : > { %v2661_v50 = vsel %vm1078_vm1, %v2659_v58, 0.0 }
 0xcf2   : > { %v2650_v60 = vadd.f32 %v2649_v59, %v2642_v57  ;;  %2662 = vadd.xlane.f32.xlu1 %v2661_v50 }
 0xcf4   : > { %v2651_v61 = vrot.slane %v2650_v60, 2 }
 0xcf6   : > { %v2652_v62 = vadd.f32 %v2651_v61, %v2650_v60 }
 0xcf8   : > { %v2653_v63 = vrot.slane %v2652_v62, 1 }
 0xcfa   : > { %v2654_v0 = vadd.f32 %v2653_v63, %v2652_v62 }
 0xcfc   : > { %v2656_v1 = vmul.f32 0.00390625, %v2654_v0 }
 0xcfe   : > { %v2658_v2 = vsub.f32 %v2632_v46, %v2656_v1 }
 0xd00   : > { %v2660_v3 = vmul.f32 %v2658_v2, %v2658_v2 }
 0xd02   : > { %v2664_v4 = vsel %vm1078_vm1, %v2660_v3, 0.0 }
 0xd03   : > { %2665 = vadd.xlane.f32.xlu2 %v2664_v4 }
 0xd65   : > { %v2663_v5 = vpop.xlane.xlu1 %2662 }
 0xd66   : > { %v2667_v6 = vrot.slane %v2663_v5, 4 }
 0xd68   : > { %v2668_v7 = vadd.f32 %v2667_v6, %v2663_v5 }
 0xd6a   : > { %v2669_v10 = vrot.slane %v2668_v7, 2 }
 0xd6c   : > { %v2670_v11 = vadd.f32 %v2669_v10, %v2668_v7 }
 0xd6e   : > { %v2671_v13 = vrot.slane %v2670_v11, 1 }
 0xd70   : > { %v2672_v15 = vadd.f32 %v2671_v13, %v2670_v11 }
 0xd72   : > { %v2679_v16 = vmul.f32 0.00390625, %v2672_v15 }
 0xd74   : > { %v2681_v17 = vadd.f32 1e-05, %v2679_v16 }
 0xd76   : > { %3426 = vrsqrt.f32 %v2681_v17  ;;  %v2666_v18 = vpop.xlane.xlu2 %2665  ;;  %vm2689_vm5 = vweird.f32 %v2681_v17 }
 0xd77   : > { %v2673_v19 = vrot.slane %v2666_v18, 4 }
 0xd79   : > { %v2674_v20 = vadd.f32 %v2673_v19, %v2666_v18 }
 0xd7b   : > { %v2675_v21 = vrot.slane %v2674_v20, 2 }
 0xd7c   : > { %v3427_v22 = vpop.eup %3426 }
 0xd7d   : > { %v2684_v23 = vmul.f32 %v3427_v22, %v2681_v17  ;;  %v2676_v24 = vadd.f32 %v2675_v21, %v2674_v20  ;;  %vm2690_vm4 = vweird.f32 %v3427_v22 }
 0xd7e   : > { %vm2691_vm6 = vmor %vm2689_vm5, %vm2690_vm4 }
 0xd7f   : > { %v2685_v25 = vmul.f32 %v3427_v22, %v2684_v23  ;;  %v2677_v26 = vrot.slane %v2676_v24, 1 }
 0xd81   : > { %v2686_v30 = vmul.f32 0.5, %v2685_v25  ;;  %v2678_v27 = vadd.f32 %v2677_v26, %v2676_v24 }
 0xd83   : > { %v2687_v28 = vsub.f32 1.5, %v2686_v30  ;;  %v2680_v29 = vmul.f32 0.00390625, %v2678_v27 }
 0xd85   : > { %v2688_v48 = vmul.f32 %v3427_v22, %v2687_v28  ;;  %v2682_v31 = vadd.f32 1e-05, %v2680_v29 }
 0xd87   : > { %v2692_v12 = vsel %vm2691_vm6, %v3427_v22, %v2688_v48  ;;  %3428 = vrsqrt.f32 %v2682_v31  ;;  %vm2699_vm8 = vweird.f32 %v2682_v31 }
 0xd88   : > { %v2703_v33 = vmul.f32 %v2692_v12, %v2657_v56 }
 0xd8a   : > { %v2705_v35 = vmul.f32 %v3114_v32, %v2703_v33 }
 0xd8c   : > { %v2707_v36 = vadd.f32 %v3115_v34, %v2705_v35 }
 0xd8d   : > { %v3429_v37 = vpop.eup %3428 }
 0xd8e   : > { %v2694_v55 = vmul.f32 %v3429_v37, %v2682_v31  ;;  %2709 = vst.msk [vmem:[#allocation17] sm:$0xff] %vm1078_vm1, %v2707_v36  ;;  %vm2700_vm7 = vweird.f32 %v3429_v37 }
 0xd8f   : > { %vm2701_vm9 = vmor %vm2699_vm8, %vm2700_vm7 }
 0xd90   : > { %v2695_v38 = vmul.f32 %v3429_v37, %v2694_v55 }
 0xd92   : > { %v2696_v39 = vmul.f32 0.5, %v2695_v38 }
 0xd94   : > { %v2697_v40 = vsub.f32 1.5, %v2696_v39 }
 0xd96   : > { %v2698_v41 = vmul.f32 %v3429_v37, %v2697_v40 }
 0xd98   : > { %v2702_v42 = vsel %vm2701_vm9, %v3429_v37, %v2698_v41 }
 0xd99   : > { %v2704_v43 = vmul.f32 %v2702_v42, %v2658_v2 }
 0xd9b   : > { %v2706_v44 = vmul.f32 %v3114_v32, %v2704_v43 }
 0xd9d   : > { %v2708_v45 = vadd.f32 %v3115_v34, %v2706_v44 }
 0xd9f   : > { %2710 = vst.msk [vmem:[#allocation17 + $0x8] sm:$0xff] %vm1078_vm1, %v2708_v45 }
 0xda0   : > { %3230 = dma.vmem_to_hbm [thread:$0]  (%p3274_p8), %s2717_s13, 256, %s2719_s23, [#allocation5], %s3833_s4, %s3833_s4, %s3829_s27  }
 0xda1   : > { %3791 = dma.done.wait (%p3274_p8), [#allocation5], 256  }
 0xda2   : > { %3793 = vsyncadd (%p3274_p8), [#allocation5], 4294967040 }
 0xda3 PF: > { %s4669_s24 = sld [smem:[#allocation24_spill]]  ;;  %s4672_s1 = smov %s3800_s22 }
 0xda4   : > { %s4670_s25 = sld [smem:[#allocation23_spill]] }
 0xda5   : > { %s4671_s23 = sld [smem:[#allocation25_spill]] }
 0xda9   : > { %p31_p9 = scmp.ge.s32.totalorder %s4669_s24, 4  }
 0xdaa   : > { %s4673_s22 = smov %s4670_s25 }
 0xdab   :  { %33 = sbr.rel (!%p31_p9) target bundleno = 23 (0x17), region = 245 }
 0xdb0   :  { %2735 = vsyncpa [#allocation4], 1 }
 0xdb1   :  { %2737 = vsyncpa [#allocation4 + $0x1], 1 }
 0xdb2   :  { %2738 = vsyncpa [#allocation7], 1 }
 0xdb3   :  { %2739 = vsyncpa [#allocation10], 1 }
 0xdb4   :  { %2740 = vsyncpa [#allocation5], 1 }
 0xdb5   :  { %2742 = vsyncpa [#allocation5 + $0x1], 1 }

</bundles_post_ra>
